<compile_context>
chip_gen: v7x
topology: tpu7x:2x2x1
jax: 0.10.0
libtpu: 0.0.40
codegen_flags: <defaults>
</compile_context>

<pallas_src>
import functools

import jax
import jax.numpy as jnp
from jax import lax
from jax.experimental import pallas as pl
from jax.experimental.pallas import tpu as pltpu

LANE = 128
SUBLANE = 8


def _round_up(v, m):
    return (v + m - 1) // m * m


def _pad2d(a, rows, cols):
    r, c = a.shape
    return jnp.pad(a, ((0, rows - r), (0, cols - c)))


# ----------------------------------------------------------------------------
# Fused forward kernel
# ----------------------------------------------------------------------------
def _gine_forward_kernel(
    # graph tensors / indices
    x_ref, eattr_ref, ext_ref, src_ref, dst_ref, batch_ref, invcnt_ref,
    # encoders
    nw_ref, nb_ref, ew0_ref, eb0_ref, ew1_ref, eb1_ref,
    # conv stacks (L,H,H)/(L,1,H) and folded BN affine (L,1,H)
    cw0_ref, cb0_ref, cw1_ref, cb1_ref, bns_ref, bnb_ref,
    # externals MLP
    xw0_ref, xb0_ref, xw1_ref, xb1_ref,
    # final regressor (first weight split into graph / externals halves)
    fw0g_ref, fw0e_ref, fb0_ref, fw1_ref, fb1_ref,
    # output
    o_ref,
    *, num_layers, eps):
    f32 = jnp.float32
    bf16 = jnp.bfloat16

    E = src_ref.shape[0]
    N = x_ref.shape[0]
    G = ext_ref.shape[0]

    # One-hot gather/scatter/pool masks built in-register from the int32 index
    # vectors (0/1 is exact in bf16); built ONCE, reused by every layer.
    # Padded edges/nodes carry index -1 so they never match a real row.
    node_col = lax.broadcasted_iota(jnp.int32, (E, N), 1)
    gather = (src_ref[...] == node_col).astype(bf16)       # (E,N): row e = one-hot(src[e])
    node_row = lax.broadcasted_iota(jnp.int32, (N, E), 0)
    scatter = (node_row == dst_ref[...]).astype(bf16)      # (N,E): row i marks edges dst==i
    graph_row = lax.broadcasted_iota(jnp.int32, (G, N), 0)
    pool01 = (graph_row == batch_ref[...]).astype(bf16)    # (G,N): graph membership

    # node encoder (no activation); bf16 operands, f32 accumulation
    h = jnp.dot(x_ref[...].astype(bf16), nw_ref[...],
                preferred_element_type=f32) + nb_ref[...]

    # edge encoder: Linear -> ReLU -> Linear
    e = jnp.dot(eattr_ref[...].astype(bf16), ew0_ref[...],
                preferred_element_type=f32) + eb0_ref[...]
    e = jnp.maximum(e, 0.0)
    edge_emb = jnp.dot(e.astype(bf16), ew1_ref[...],
                       preferred_element_type=f32) + eb1_ref[...]

    # GINEConv layers: fori_loop bounds live ranges to one layer at a time.
    def layer(l, h):
        x_src = jnp.dot(gather, h.astype(bf16), preferred_element_type=f32)   # (E,H) x[src]
        msg = jnp.maximum(x_src + edge_emb, 0.0)                               # ReLU(x_j + e_ji)
        agg = jnp.dot(scatter, msg.astype(bf16), preferred_element_type=f32)  # (N,H) sum by dst
        if eps == 0.0:                                                         # trace-time branch
            z = h + agg
        else:
            z = (1.0 + eps) * h + agg
        # conv MLP: Linear -> ReLU -> Linear (bf16 dots, f32 bias/activation)
        z = jnp.dot(z.astype(bf16), cw0_ref[l], preferred_element_type=f32) + cb0_ref[l]
        z = jnp.maximum(z, 0.0)
        z = jnp.dot(z.astype(bf16), cw1_ref[l], preferred_element_type=f32) + cb1_ref[l]
        # eval-mode BatchNorm (pre-folded affine) + ReLU; Dropout = identity
        return jnp.maximum(z * bns_ref[l] + bnb_ref[l], 0.0)

    h = lax.fori_loop(0, num_layers, layer, h)

    # ---- epilogue: mean pool + externals MLP + final regressor, fused ----
    # sum via bf16 one-hot dot, divide by node counts in f32
    graph_emb = jnp.dot(pool01, h.astype(bf16),
                        preferred_element_type=f32) * invcnt_ref[...]          # (G,H)

    ext = jnp.dot(ext_ref[...].astype(bf16), xw0_ref[...],
                  preferred_element_type=f32) + xb0_ref[...]
    ext = jnp.maximum(ext, 0.0)
    ext_emb = jnp.dot(ext.astype(bf16), xw1_ref[...],
                      preferred_element_type=f32) + xb1_ref[...]

    # concat([graph_emb, ext_emb]) @ W0  ==  graph_emb @ W0g + ext_emb @ W0e
    y = (jnp.dot(graph_emb.astype(bf16), fw0g_ref[...], preferred_element_type=f32)
         + jnp.dot(ext_emb.astype(bf16), fw0e_ref[...], preferred_element_type=f32)
         + fb0_ref[...])
    y = jnp.maximum(y, 0.0)
    out = jnp.dot(y.astype(bf16), fw1_ref[...], preferred_element_type=f32) + fb1_ref[...]
    o_ref[...] = out.astype(o_ref.dtype)                                       # (G,128), col 0 real


# ----------------------------------------------------------------------------
# Parameter setup + wrapper (all glue is trace-time / one-off JAX ops)
# ----------------------------------------------------------------------------
def init_params(key, node_in_dim, edge_in_dim, external_in_dim,
                hidden_dim, num_layers):
    ks = iter(jax.random.split(key, 64))

    def lin(in_d, out_d):
        w = jax.random.normal(next(ks), (in_d, out_d), jnp.float32) * 0.1
        b = jax.random.normal(next(ks), (out_d,), jnp.float32) * 0.01
        return {"w": w, "b": b}

    params = {
        "node_encoder": lin(node_in_dim, hidden_dim),
        "edge_encoder": [lin(edge_in_dim, hidden_dim),
                         lin(hidden_dim, hidden_dim)],
        "convs": [],
        "bns": [],
        "externals_mlp": [lin(external_in_dim, hidden_dim),
                          lin(hidden_dim, hidden_dim)],
        "final_regressor": [lin(2 * hidden_dim, hidden_dim),
                            lin(hidden_dim, 1)],
    }
    for _ in range(num_layers):
        params["convs"].append([lin(hidden_dim, hidden_dim),
                                lin(hidden_dim, hidden_dim)])
        params["bns"].append({
            "gamma": jnp.ones((hidden_dim,), jnp.float32),
            "beta": jnp.zeros((hidden_dim,), jnp.float32),
            # deterministic, slightly non-trivial running stats (eval mode)
            "mean": jnp.full((hidden_dim,), 0.05, jnp.float32),
            "var": jnp.full((hidden_dim,), 1.1, jnp.float32),
        })
    return params


def gine_regression_forward(params, x, edge_index, edge_attr, batch,
                            externals, num_graphs, *, eps=0.0, bn_eps=1e-5):
    f32 = jnp.float32
    bf16 = jnp.bfloat16
    H = params["node_encoder"]["w"].shape[1]
    num_layers = len(params["convs"])

    N_raw, _ = x.shape
    E_raw = edge_index.shape[1]
    G_raw = externals.shape[0]

    # padded row counts (sublane multiples) and lane-padded feature dims
    N = _round_up(max(N_raw, SUBLANE), SUBLANE)
    E = _round_up(max(E_raw, SUBLANE), SUBLANE)
    G = _round_up(max(G_raw, SUBLANE), SUBLANE)
    # TODO(synk): minor win -- skip the K-dim lane padding of the tiny encoder
    # inputs and let Mosaic handle the small contraction dims directly.
    Fn = _round_up(x.shape[1], LANE)
    Fe = _round_up(edge_attr.shape[1], LANE)
    Fx = _round_up(externals.shape[1], LANE)

    src = edge_index[0].astype(jnp.int32)
    dst = edge_index[1].astype(jnp.int32)
    # pad indices with -1 so padded edges / nodes match nothing in the kernel
    src_2d = jnp.full((E, 1), -1, jnp.int32).at[:E_raw, 0].set(src)
    dst_2d = jnp.full((1, E), -1, jnp.int32).at[0, :E_raw].set(dst)
    batch_2d = jnp.full((1, N), -1, jnp.int32).at[0, :N_raw].set(batch.astype(jnp.int32))

    # per-graph node counts -> inverse (mean pool), kept in f32
    graph_ids = jnp.arange(G, dtype=jnp.int32)
    counts = (batch_2d == graph_ids[:, None]).astype(f32).sum(axis=1, keepdims=True)
    invcnt = 1.0 / jnp.maximum(counts, 1.0)                     # (G,1) f32

    # pad dense inputs (zero columns/rows -> exact results)
    x_p = _pad2d(x.astype(f32), N, Fn)
    ea_p = _pad2d(edge_attr.astype(f32), E, Fe)
    ext_p = _pad2d(externals.astype(f32), G, Fx)

    def pad_w_bf16(w, rows):
        return _pad2d(w.astype(f32), rows, w.shape[1]).astype(bf16)

    def row_b(b):
        return b.astype(f32).reshape(1, -1)

    nw = pad_w_bf16(params["node_encoder"]["w"], Fn)
    nb = row_b(params["node_encoder"]["b"])
    e0, e1 = params["edge_encoder"]
    ew0 = pad_w_bf16(e0["w"], Fe)
    eb0 = row_b(e0["b"])
    ew1 = e1["w"].astype(bf16)
    eb1 = row_b(e1["b"])

    cw0 = jnp.stack([c[0]["w"] for c in params["convs"]]).astype(bf16)      # (L,H,H)
    cb0 = jnp.stack([c[0]["b"].reshape(1, -1) for c in params["convs"]]).astype(f32)
    cw1 = jnp.stack([c[1]["w"] for c in params["convs"]]).astype(bf16)
    cb1 = jnp.stack([c[1]["b"].reshape(1, -1) for c in params["convs"]]).astype(f32)

    # fold eval-mode BatchNorm into one affine per layer: y = x*scale + bias (f32)
    bn_s, bn_b = [], []
    for bn in params["bns"]:
        inv = 1.0 / jnp.sqrt(bn["var"].astype(f32) + bn_eps)
        s = bn["gamma"].astype(f32) * inv
        bn_s.append(s.reshape(1, -1))
        bn_b.append((bn["beta"].astype(f32) - bn["mean"].astype(f32) * s).reshape(1, -1))
    bns = jnp.stack(bn_s)                                                   # (L,1,H) f32
    bnb = jnp.stack(bn_b)

    x0p, x1p = params["externals_mlp"]
    xw0 = pad_w_bf16(x0p["w"], Fx)
    xb0 = row_b(x0p["b"])
    xw1 = x1p["w"].astype(bf16)
    xb1 = row_b(x1p["b"])

    f0, f1 = params["final_regressor"]
    fw0 = f0["w"].astype(f32)                 # (2H, H) -> split for concat-free dot
    fw0g, fw0e = fw0[:H].astype(bf16), fw0[H:].astype(bf16)
    fb0 = row_b(f0["b"])
    # lane-dense final projection: pad (H,1) -> (H,128); real output in col 0
    fw1 = _pad2d(f1["w"].astype(f32), H, LANE).astype(bf16)
    fb1 = _pad2d(f1["b"].astype(f32).reshape(1, 1), 1, LANE)

    operands = (x_p, ea_p, ext_p, src_2d, dst_2d, batch_2d, invcnt,
                nw, nb, ew0, eb0, ew1, eb1,
                cw0, cb0, cw1, cb1, bns, bnb,
                xw0, xb0, xw1, xb1,
                fw0g, fw0e, fb0, fw1, fb1)

    # ---- advisory cost estimate + VMEM budget (actual need, capped at 48 MiB) ----
    flops = (2 * N * Fn * H + 2 * E * Fe * H + 2 * E * H * H          # encoders
             + num_layers * (2 * E * N * H + 2 * N * E * H + 4 * N * H * H)  # conv layers
             + 2 * G * N * H                                          # mean pool
             + 2 * G * Fx * H + 2 * G * H * H                          # externals MLP
             + 4 * G * H * H + 2 * G * H * LANE)                       # final regressor
    io_bytes = sum(int(a.size) * a.dtype.itemsize for a in operands) + G * LANE * 4
    cost = pl.CostEstimate(flops=int(flops), transcendentals=0,
                           bytes_accessed=int(io_bytes))

    vmem_need = (2 * io_bytes                       # resident operands + headroom
                 + 2 * (E * N + N * E + G * N)      # in-kernel bf16 masks
                 + 8 * (N + E + G) * H * 4)         # f32 activations / temporaries
    vmem_limit = int(min(48 * 1024 * 1024, max(8 * 1024 * 1024, vmem_need)))

    out_pad = pl.pallas_call(
        functools.partial(_gine_forward_kernel, num_layers=num_layers, eps=eps),
        out_shape=jax.ShapeDtypeStruct((G, LANE), f32),
        compiler_params=pltpu.CompilerParams(vmem_limit_bytes=vmem_limit),
        cost_estimate=cost,
    )(*operands)

    return out_pad[:G_raw, 0]                 # (G,)


# ----------------------------------------------------------------------------
if __name__ == "__main__":
    key = jax.random.PRNGKey(0)

    node_in_dim = 8
    edge_in_dim = 4
    external_in_dim = 6
    hidden_dim = 128          # PyTorch default; lane-native on TPU
    num_layers = 3

    num_graphs = 2
    nodes_per_graph = 8
    N = num_graphs * nodes_per_graph

    k_x, k_e, k_ext, k_p = jax.random.split(key, 4)

    x = jax.random.normal(k_x, (N, node_in_dim), jnp.float32)

    # Build edges: directed ring per graph (both directions) -> E = 32
    src_list, dst_list = [], []
    for g in range(num_graphs):
        base = g * nodes_per_graph
        for i in range(nodes_per_graph):
            a = base + i
            b = base + (i + 1) % nodes_per_graph
            src_list += [a, b]
            dst_list += [b, a]
    edge_index = jnp.array([src_list, dst_list], dtype=jnp.int32)   # (2, E)
    E = edge_index.shape[1]
    edge_attr = jax.random.normal(k_e, (E, edge_in_dim), jnp.float32)

    batch = jnp.repeat(jnp.arange(num_graphs, dtype=jnp.int32), nodes_per_graph)
    externals = jax.random.normal(k_ext, (num_graphs, external_in_dim),
                                  jnp.float32)

    params = init_params(k_p, node_in_dim, edge_in_dim, external_in_dim,
                         hidden_dim, num_layers)

    out = gine_regression_forward(params, x, edge_index, edge_attr, batch,
                                  externals, num_graphs)
    out = jax.block_until_ready(out)
    assert out.shape == (num_graphs,)
    assert jnp.all(jnp.isfinite(out))
    print("KERNEL_OK")
</pallas_src>

<mosaic_0001>
module attributes {stable_mosaic.version = 11 : i64} {
  func.func @_gine_forward_kernel(%arg0: memref<16x128xf32, #tpu.memory_space<vmem>>, %arg1: memref<32x128xf32, #tpu.memory_space<vmem>>, %arg2: memref<8x128xf32, #tpu.memory_space<vmem>>, %arg3: memref<32x1xi32, #tpu.memory_space<vmem>>, %arg4: memref<1x32xi32, #tpu.memory_space<vmem>>, %arg5: memref<1x16xi32, #tpu.memory_space<vmem>>, %arg6: memref<8x1xf32, #tpu.memory_space<vmem>>, %arg7: memref<128x128xbf16, #tpu.memory_space<vmem>>, %arg8: memref<1x128xf32, #tpu.memory_space<vmem>>, %arg9: memref<128x128xbf16, #tpu.memory_space<vmem>>, %arg10: memref<1x128xf32, #tpu.memory_space<vmem>>, %arg11: memref<128x128xbf16, #tpu.memory_space<vmem>>, %arg12: memref<1x128xf32, #tpu.memory_space<vmem>>, %arg13: memref<3x128x128xbf16, #tpu.memory_space<vmem>>, %arg14: memref<3x1x128xf32, #tpu.memory_space<vmem>>, %arg15: memref<3x128x128xbf16, #tpu.memory_space<vmem>>, %arg16: memref<3x1x128xf32, #tpu.memory_space<vmem>>, %arg17: memref<3x1x128xf32, #tpu.memory_space<vmem>>, %arg18: memref<3x1x128xf32, #tpu.memory_space<vmem>>, %arg19: memref<128x128xbf16, #tpu.memory_space<vmem>>, %arg20: memref<1x128xf32, #tpu.memory_space<vmem>>, %arg21: memref<128x128xbf16, #tpu.memory_space<vmem>>, %arg22: memref<1x128xf32, #tpu.memory_space<vmem>>, %arg23: memref<128x128xbf16, #tpu.memory_space<vmem>>, %arg24: memref<128x128xbf16, #tpu.memory_space<vmem>>, %arg25: memref<1x128xf32, #tpu.memory_space<vmem>>, %arg26: memref<128x128xbf16, #tpu.memory_space<vmem>>, %arg27: memref<1x128xf32, #tpu.memory_space<vmem>>, %arg28: memref<8x128xf32, #tpu.memory_space<vmem>>) attributes {dimension_semantics = [], scalar_prefetch = 0 : i64, scratch_operands = 0 : i64, tpu.core_type = #tpu.core_type<tc>} {
    %0 = tpu.iota {dimensions = array<i32: 1>} : vector<32x16xi32>
    %c0 = arith.constant 0 : index
    %c0_0 = arith.constant 0 : index
    %1 = vector.load %arg3[%c0, %c0_0] : memref<32x1xi32, #tpu.memory_space<vmem>>, vector<32x1xi32>
    %2 = vector.broadcast %1 : vector<32x1xi32> to vector<32x16xi32>
    %3 = arith.cmpi eq, %2, %0 : vector<32x16xi32>
    %4 = arith.extui %3 : vector<32x16xi1> to vector<32x16xi32>
    %5 = arith.sitofp %4 : vector<32x16xi32> to vector<32x16xf32>
    %6 = arith.truncf %5 : vector<32x16xf32> to vector<32x16xbf16>
    %7 = tpu.iota {dimensions = array<i32: 0>} : vector<16x32xi32>
    %c0_1 = arith.constant 0 : index
    %c0_2 = arith.constant 0 : index
    %8 = vector.load %arg4[%c0_1, %c0_2] : memref<1x32xi32, #tpu.memory_space<vmem>>, vector<1x32xi32>
    %9 = vector.broadcast %8 : vector<1x32xi32> to vector<16x32xi32>
    %10 = arith.cmpi eq, %7, %9 : vector<16x32xi32>
    %11 = arith.extui %10 : vector<16x32xi1> to vector<16x32xi32>
    %12 = arith.sitofp %11 : vector<16x32xi32> to vector<16x32xf32>
    %13 = arith.truncf %12 : vector<16x32xf32> to vector<16x32xbf16>
    %14 = tpu.iota {dimensions = array<i32: 0>} : vector<8x16xi32>
    %c0_3 = arith.constant 0 : index
    %c0_4 = arith.constant 0 : index
    %15 = vector.load %arg5[%c0_3, %c0_4] : memref<1x16xi32, #tpu.memory_space<vmem>>, vector<1x16xi32>
    %16 = vector.broadcast %15 : vector<1x16xi32> to vector<8x16xi32>
    %17 = arith.cmpi eq, %14, %16 : vector<8x16xi32>
    %18 = arith.extui %17 : vector<8x16xi1> to vector<8x16xi32>
    %19 = arith.sitofp %18 : vector<8x16xi32> to vector<8x16xf32>
    %20 = arith.truncf %19 : vector<8x16xf32> to vector<8x16xbf16>
    %c0_5 = arith.constant 0 : index
    %c0_6 = arith.constant 0 : index
    %21 = vector.load %arg0[%c0_5, %c0_6] : memref<16x128xf32, #tpu.memory_space<vmem>>, vector<16x128xf32>
    %22 = arith.truncf %21 : vector<16x128xf32> to vector<16x128xbf16>
    %c0_7 = arith.constant 0 : index
    %c0_8 = arith.constant 0 : index
    %23 = vector.load %arg7[%c0_7, %c0_8] : memref<128x128xbf16, #tpu.memory_space<vmem>>, vector<128x128xbf16>
    %cst = arith.constant dense<0.000000e+00> : vector<16x128xf32>
    %24 = tpu.matmul %22, %23, %cst {dimension_numbers = #tpu.dot_dimension_numbers<[1], [0], [0], [1], [0, 0, 1, 1], [], []>} : vector<16x128xbf16>, vector<128x128xbf16>, vector<16x128xf32> -> vector<16x128xf32>
    %c0_9 = arith.constant 0 : index
    %c0_10 = arith.constant 0 : index
    %25 = vector.load %arg8[%c0_9, %c0_10] : memref<1x128xf32, #tpu.memory_space<vmem>>, vector<1x128xf32>
    %26 = vector.broadcast %25 : vector<1x128xf32> to vector<16x128xf32>
    %27 = arith.addf %24, %26 : vector<16x128xf32>
    %c0_11 = arith.constant 0 : index
    %c0_12 = arith.constant 0 : index
    %28 = vector.load %arg1[%c0_11, %c0_12] : memref<32x128xf32, #tpu.memory_space<vmem>>, vector<32x128xf32>
    %29 = arith.truncf %28 : vector<32x128xf32> to vector<32x128xbf16>
    %c0_13 = arith.constant 0 : index
    %c0_14 = arith.constant 0 : index
    %30 = vector.load %arg9[%c0_13, %c0_14] : memref<128x128xbf16, #tpu.memory_space<vmem>>, vector<128x128xbf16>
    %cst_15 = arith.constant dense<0.000000e+00> : vector<32x128xf32>
    %31 = tpu.matmul %29, %30, %cst_15 {dimension_numbers = #tpu.dot_dimension_numbers<[1], [0], [0], [1], [0, 0, 1, 1], [], []>} : vector<32x128xbf16>, vector<128x128xbf16>, vector<32x128xf32> -> vector<32x128xf32>
    %c0_16 = arith.constant 0 : index
    %c0_17 = arith.constant 0 : index
    %32 = vector.load %arg10[%c0_16, %c0_17] : memref<1x128xf32, #tpu.memory_space<vmem>>, vector<1x128xf32>
    %33 = vector.broadcast %32 : vector<1x128xf32> to vector<32x128xf32>
    %34 = arith.addf %31, %33 : vector<32x128xf32>
    %cst_18 = arith.constant 0.000000e+00 : f32
    %35 = vector.broadcast %cst_18 : f32 to vector<32x128xf32>
    %36 = arith.maximumf %34, %35 : vector<32x128xf32>
    %37 = arith.truncf %36 : vector<32x128xf32> to vector<32x128xbf16>
    %c0_19 = arith.constant 0 : index
    %c0_20 = arith.constant 0 : index
    %38 = vector.load %arg11[%c0_19, %c0_20] : memref<128x128xbf16, #tpu.memory_space<vmem>>, vector<128x128xbf16>
    %cst_21 = arith.constant dense<0.000000e+00> : vector<32x128xf32>
    %39 = tpu.matmul %37, %38, %cst_21 {dimension_numbers = #tpu.dot_dimension_numbers<[1], [0], [0], [1], [0, 0, 1, 1], [], []>} : vector<32x128xbf16>, vector<128x128xbf16>, vector<32x128xf32> -> vector<32x128xf32>
    %c0_22 = arith.constant 0 : index
    %c0_23 = arith.constant 0 : index
    %40 = vector.load %arg12[%c0_22, %c0_23] : memref<1x128xf32, #tpu.memory_space<vmem>>, vector<1x128xf32>
    %41 = vector.broadcast %40 : vector<1x128xf32> to vector<32x128xf32>
    %42 = arith.addf %39, %41 : vector<32x128xf32>
    %c0_i32 = arith.constant 0 : i32
    %c3_i32 = arith.constant 3 : i32
    %43 = arith.addi %c0_i32, %c3_i32 : i32
    %c1_i32 = arith.constant 1 : i32
    %44 = scf.for %arg29 = %c0_i32 to %43 step %c1_i32 iter_args(%arg30 = %27) -> (vector<16x128xf32>)  : i32 {
      %84 = arith.truncf %arg30 : vector<16x128xf32> to vector<16x128xbf16>
      %cst_57 = arith.constant dense<0.000000e+00> : vector<32x128xf32>
      %85 = tpu.matmul %6, %84, %cst_57 {dimension_numbers = #tpu.dot_dimension_numbers<[1], [0], [0], [1], [0, 0, 1, 1], [], []>} : vector<32x16xbf16>, vector<16x128xbf16>, vector<32x128xf32> -> vector<32x128xf32>
      %86 = arith.addf %85, %42 : vector<32x128xf32>
      %cst_58 = arith.constant 0.000000e+00 : f32
      %87 = vector.broadcast %cst_58 : f32 to vector<32x128xf32>
      %88 = arith.maximumf %86, %87 : vector<32x128xf32>
      %89 = arith.truncf %88 : vector<32x128xf32> to vector<32x128xbf16>
      %cst_59 = arith.constant dense<0.000000e+00> : vector<16x128xf32>
      %90 = tpu.matmul %13, %89, %cst_59 {dimension_numbers = #tpu.dot_dimension_numbers<[1], [0], [0], [1], [0, 0, 1, 1], [], []>} : vector<16x32xbf16>, vector<32x128xbf16>, vector<16x128xf32> -> vector<16x128xf32>
      %91 = arith.addf %arg30, %90 : vector<16x128xf32>
      %92 = arith.truncf %91 : vector<16x128xf32> to vector<16x128xbf16>
      %93 = arith.index_cast %arg29 : i32 to index
      %c0_60 = arith.constant 0 : index
      %c0_61 = arith.constant 0 : index
      %94 = vector.load %arg13[%93, %c0_60, %c0_61] : memref<3x128x128xbf16, #tpu.memory_space<vmem>>, vector<1x128x128xbf16>
      %95 = vector.shape_cast %94 : vector<1x128x128xbf16> to vector<128x128xbf16>
      %cst_62 = arith.constant dense<0.000000e+00> : vector<16x128xf32>
      %96 = tpu.matmul %92, %95, %cst_62 {dimension_numbers = #tpu.dot_dimension_numbers<[1], [0], [0], [1], [0, 0, 1, 1], [], []>} : vector<16x128xbf16>, vector<128x128xbf16>, vector<16x128xf32> -> vector<16x128xf32>
      %97 = arith.index_cast %arg29 : i32 to index
      %c0_63 = arith.constant 0 : index
      %c0_64 = arith.constant 0 : index
      %98 = vector.load %arg14[%97, %c0_63, %c0_64] : memref<3x1x128xf32, #tpu.memory_space<vmem>>, vector<1x1x128xf32>
      %99 = vector.shape_cast %98 : vector<1x1x128xf32> to vector<1x128xf32>
      %100 = vector.broadcast %99 : vector<1x128xf32> to vector<16x128xf32>
      %101 = arith.addf %96, %100 : vector<16x128xf32>
      %cst_65 = arith.constant 0.000000e+00 : f32
      %102 = vector.broadcast %cst_65 : f32 to vector<16x128xf32>
      %103 = arith.maximumf %101, %102 : vector<16x128xf32>
      %104 = arith.truncf %103 : vector<16x128xf32> to vector<16x128xbf16>
      %105 = arith.index_cast %arg29 : i32 to index
      %c0_66 = arith.constant 0 : index
      %c0_67 = arith.constant 0 : index
      %106 = vector.load %arg15[%105, %c0_66, %c0_67] : memref<3x128x128xbf16, #tpu.memory_space<vmem>>, vector<1x128x128xbf16>
      %107 = vector.shape_cast %106 : vector<1x128x128xbf16> to vector<128x128xbf16>
      %cst_68 = arith.constant dense<0.000000e+00> : vector<16x128xf32>
      %108 = tpu.matmul %104, %107, %cst_68 {dimension_numbers = #tpu.dot_dimension_numbers<[1], [0], [0], [1], [0, 0, 1, 1], [], []>} : vector<16x128xbf16>, vector<128x128xbf16>, vector<16x128xf32> -> vector<16x128xf32>
      %109 = arith.index_cast %arg29 : i32 to index
      %c0_69 = arith.constant 0 : index
      %c0_70 = arith.constant 0 : index
      %110 = vector.load %arg16[%109, %c0_69, %c0_70] : memref<3x1x128xf32, #tpu.memory_space<vmem>>, vector<1x1x128xf32>
      %111 = vector.shape_cast %110 : vector<1x1x128xf32> to vector<1x128xf32>
      %112 = vector.broadcast %111 : vector<1x128xf32> to vector<16x128xf32>
      %113 = arith.addf %108, %112 : vector<16x128xf32>
      %114 = arith.index_cast %arg29 : i32 to index
      %c0_71 = arith.constant 0 : index
      %c0_72 = arith.constant 0 : index
      %115 = vector.load %arg17[%114, %c0_71, %c0_72] : memref<3x1x128xf32, #tpu.memory_space<vmem>>, vector<1x1x128xf32>
      %116 = vector.shape_cast %115 : vector<1x1x128xf32> to vector<1x128xf32>
      %117 = vector.broadcast %116 : vector<1x128xf32> to vector<16x128xf32>
      %118 = arith.mulf %113, %117 : vector<16x128xf32>
      %119 = arith.index_cast %arg29 : i32 to index
      %c0_73 = arith.constant 0 : index
      %c0_74 = arith.constant 0 : index
      %120 = vector.load %arg18[%119, %c0_73, %c0_74] : memref<3x1x128xf32, #tpu.memory_space<vmem>>, vector<1x1x128xf32>
      %121 = vector.shape_cast %120 : vector<1x1x128xf32> to vector<1x128xf32>
      %122 = vector.broadcast %121 : vector<1x128xf32> to vector<16x128xf32>
      %123 = arith.addf %118, %122 : vector<16x128xf32>
      %cst_75 = arith.constant 0.000000e+00 : f32
      %124 = vector.broadcast %cst_75 : f32 to vector<16x128xf32>
      %125 = arith.maximumf %123, %124 : vector<16x128xf32>
      scf.yield %125 : vector<16x128xf32>
    }
    %c3_i32_24 = arith.constant 3 : i32
    %45 = arith.truncf %44 : vector<16x128xf32> to vector<16x128xbf16>
    %cst_25 = arith.constant dense<0.000000e+00> : vector<8x128xf32>
    %46 = tpu.matmul %20, %45, %cst_25 {dimension_numbers = #tpu.dot_dimension_numbers<[1], [0], [0], [1], [0, 0, 1, 1], [], []>} : vector<8x16xbf16>, vector<16x128xbf16>, vector<8x128xf32> -> vector<8x128xf32>
    %c0_26 = arith.constant 0 : index
    %c0_27 = arith.constant 0 : index
    %47 = vector.load %arg6[%c0_26, %c0_27] : memref<8x1xf32, #tpu.memory_space<vmem>>, vector<8x1xf32>
    %48 = vector.broadcast %47 : vector<8x1xf32> to vector<8x128xf32>
    %49 = arith.mulf %46, %48 : vector<8x128xf32>
    %c0_28 = arith.constant 0 : index
    %c0_29 = arith.constant 0 : index
    %50 = vector.load %arg2[%c0_28, %c0_29] : memref<8x128xf32, #tpu.memory_space<vmem>>, vector<8x128xf32>
    %51 = arith.truncf %50 : vector<8x128xf32> to vector<8x128xbf16>
    %c0_30 = arith.constant 0 : index
    %c0_31 = arith.constant 0 : index
    %52 = vector.load %arg19[%c0_30, %c0_31] : memref<128x128xbf16, #tpu.memory_space<vmem>>, vector<128x128xbf16>
    %cst_32 = arith.constant dense<0.000000e+00> : vector<8x128xf32>
    %53 = tpu.matmul %51, %52, %cst_32 {dimension_numbers = #tpu.dot_dimension_numbers<[1], [0], [0], [1], [0, 0, 1, 1], [], []>} : vector<8x128xbf16>, vector<128x128xbf16>, vector<8x128xf32> -> vector<8x128xf32>
    %c0_33 = arith.constant 0 : index
    %c0_34 = arith.constant 0 : index
    %54 = vector.load %arg20[%c0_33, %c0_34] : memref<1x128xf32, #tpu.memory_space<vmem>>, vector<1x128xf32>
    %55 = vector.broadcast %54 : vector<1x128xf32> to vector<8x128xf32>
    %56 = arith.addf %53, %55 : vector<8x128xf32>
    %cst_35 = arith.constant 0.000000e+00 : f32
    %57 = vector.broadcast %cst_35 : f32 to vector<8x128xf32>
    %58 = arith.maximumf %56, %57 : vector<8x128xf32>
    %59 = arith.truncf %58 : vector<8x128xf32> to vector<8x128xbf16>
    %c0_36 = arith.constant 0 : index
    %c0_37 = arith.constant 0 : index
    %60 = vector.load %arg21[%c0_36, %c0_37] : memref<128x128xbf16, #tpu.memory_space<vmem>>, vector<128x128xbf16>
    %cst_38 = arith.constant dense<0.000000e+00> : vector<8x128xf32>
    %61 = tpu.matmul %59, %60, %cst_38 {dimension_numbers = #tpu.dot_dimension_numbers<[1], [0], [0], [1], [0, 0, 1, 1], [], []>} : vector<8x128xbf16>, vector<128x128xbf16>, vector<8x128xf32> -> vector<8x128xf32>
    %c0_39 = arith.constant 0 : index
    %c0_40 = arith.constant 0 : index
    %62 = vector.load %arg22[%c0_39, %c0_40] : memref<1x128xf32, #tpu.memory_space<vmem>>, vector<1x128xf32>
    %63 = vector.broadcast %62 : vector<1x128xf32> to vector<8x128xf32>
    %64 = arith.addf %61, %63 : vector<8x128xf32>
    %65 = arith.truncf %49 : vector<8x128xf32> to vector<8x128xbf16>
    %c0_41 = arith.constant 0 : index
    %c0_42 = arith.constant 0 : index
    %66 = vector.load %arg23[%c0_41, %c0_42] : memref<128x128xbf16, #tpu.memory_space<vmem>>, vector<128x128xbf16>
    %cst_43 = arith.constant dense<0.000000e+00> : vector<8x128xf32>
    %67 = tpu.matmul %65, %66, %cst_43 {dimension_numbers = #tpu.dot_dimension_numbers<[1], [0], [0], [1], [0, 0, 1, 1], [], []>} : vector<8x128xbf16>, vector<128x128xbf16>, vector<8x128xf32> -> vector<8x128xf32>
    %68 = arith.truncf %64 : vector<8x128xf32> to vector<8x128xbf16>
    %c0_44 = arith.constant 0 : index
    %c0_45 = arith.constant 0 : index
    %69 = vector.load %arg24[%c0_44, %c0_45] : memref<128x128xbf16, #tpu.memory_space<vmem>>, vector<128x128xbf16>
    %cst_46 = arith.constant dense<0.000000e+00> : vector<8x128xf32>
    %70 = tpu.matmul %68, %69, %cst_46 {dimension_numbers = #tpu.dot_dimension_numbers<[1], [0], [0], [1], [0, 0, 1, 1], [], []>} : vector<8x128xbf16>, vector<128x128xbf16>, vector<8x128xf32> -> vector<8x128xf32>
    %71 = arith.addf %67, %70 : vector<8x128xf32>
    %c0_47 = arith.constant 0 : index
    %c0_48 = arith.constant 0 : index
    %72 = vector.load %arg25[%c0_47, %c0_48] : memref<1x128xf32, #tpu.memory_space<vmem>>, vector<1x128xf32>
    %73 = vector.broadcast %72 : vector<1x128xf32> to vector<8x128xf32>
    %74 = arith.addf %71, %73 : vector<8x128xf32>
    %cst_49 = arith.constant 0.000000e+00 : f32
    %75 = vector.broadcast %cst_49 : f32 to vector<8x128xf32>
    %76 = arith.maximumf %74, %75 : vector<8x128xf32>
    %77 = arith.truncf %76 : vector<8x128xf32> to vector<8x128xbf16>
    %c0_50 = arith.constant 0 : index
    %c0_51 = arith.constant 0 : index
    %78 = vector.load %arg26[%c0_50, %c0_51] : memref<128x128xbf16, #tpu.memory_space<vmem>>, vector<128x128xbf16>
    %cst_52 = arith.constant dense<0.000000e+00> : vector<8x128xf32>
    %79 = tpu.matmul %77, %78, %cst_52 {dimension_numbers = #tpu.dot_dimension_numbers<[1], [0], [0], [1], [0, 0, 1, 1], [], []>} : vector<8x128xbf16>, vector<128x128xbf16>, vector<8x128xf32> -> vector<8x128xf32>
    %c0_53 = arith.constant 0 : index
    %c0_54 = arith.constant 0 : index
    %80 = vector.load %arg27[%c0_53, %c0_54] : memref<1x128xf32, #tpu.memory_space<vmem>>, vector<1x128xf32>
    %81 = vector.broadcast %80 : vector<1x128xf32> to vector<8x128xf32>
    %82 = arith.addf %79, %81 : vector<8x128xf32>
    %c0_55 = arith.constant 0 : index
    %c0_56 = arith.constant 0 : index
    %83 = vector.load %arg28[%c0_55, %c0_56] : memref<8x128xf32, #tpu.memory_space<vmem>>, vector<8x128xf32>
    tpu.vector_store %arg28[%c0_55, %c0_56], %82 {strides = array<i32>} : memref<8x128xf32, #tpu.memory_space<vmem>>, vector<8x128xf32>,
    return
  }
}

</mosaic_0001>

<bundles_post_ra>
// kernel: tpu_custom_call.1
= control target key start
LH: loop header
LB: loop body
LE: loop exit
PB: predicated region body
PF: predicated region fallthrough
CT: control target
= control target key end

     0   :  { %s3699_s0 = inlined_call_operand.hbm [shape: f32[16,128], index: 0, kind: input, shape index: {}]   ;;  %s3700_s1 = inlined_call_operand.hbm [shape: f32[32,128], index: 1, kind: input, shape index: {}]   ;;  %s3701_s2 = inlined_call_operand.hbm [shape: f32[8,128], index: 2, kind: input, shape index: {}]   ;;  %s3702_s3 = inlined_call_operand.vmem [shape: s32[32,1], index: 3, kind: input, shape index: {}]   ;;  %s3703_s4 = inlined_call_operand.vmem [shape: s32[1,32], index: 4, kind: input, shape index: {}]   ;;  %s3704_s5 = inlined_call_operand.hbm [shape: s32[1,16], index: 5, kind: input, shape index: {}]   ;;  %s3705_s6 = inlined_call_operand.vmem [shape: f32[8,1], index: 6, kind: input, shape index: {}]   ;;  %s3706_s7 = inlined_call_operand.vmem [shape: bf16[128,128], index: 7, kind: input, shape index: {}]   ;;  %s3707_s8 = inlined_call_operand.hbm [shape: f32[1,128], index: 8, kind: input, shape index: {}]   ;;  %s3708_s9 = inlined_call_operand.hbm [shape: bf16[128,128], index: 9, kind: input, shape index: {}]   ;;  %s3709_s10 = inlined_call_operand.hbm [shape: f32[1,128], index: 10, kind: input, shape index: {}]   ;;  %s3710_s11 = inlined_call_operand.hbm [shape: bf16[128,128], index: 11, kind: input, shape index: {}]   ;;  %s3711_s12 = inlined_call_operand.hbm [shape: f32[1,128], index: 12, kind: input, shape index: {}]   ;;  %s3712_s13 = inlined_call_operand.hbm [shape: bf16[3,128,128], index: 13, kind: input, shape index: {}]   ;;  %s3713_s14 = inlined_call_operand.hbm [shape: f32[3,1,128], index: 14, kind: input, shape index: {}]   ;;  %s3714_s15 = inlined_call_operand.hbm [shape: bf16[3,128,128], index: 15, kind: input, shape index: {}]   ;;  %s3715_s16 = inlined_call_operand.hbm [shape: f32[3,1,128], index: 16, kind: input, shape index: {}]   ;;  %s3716_s17 = inlined_call_operand.hbm [shape: f32[3,1,128], index: 17, kind: input, shape index: {}]   ;;  %s3717_s18 = inlined_call_operand.hbm [shape: f32[3,1,128], index: 18, kind: input, shape index: {}]   ;;  %s3718_s19 = inlined_call_operand.hbm [shape: bf16[128,128], index: 19, kind: input, shape index: {}]   ;;  %s3719_s20 = inlined_call_operand.hbm [shape: f32[1,128], index: 20, kind: input, shape index: {}]   ;;  %s3720_s21 = inlined_call_operand.hbm [shape: bf16[128,128], index: 21, kind: input, shape index: {}]   ;;  %s3721_s22 = inlined_call_operand.hbm [shape: f32[1,128], index: 22, kind: input, shape index: {}]   ;;  %s3722_s23 = inlined_call_operand.vmem [shape: bf16[128,128], index: 23, kind: input, shape index: {}]   ;;  %s3723_s24 = inlined_call_operand.hbm [shape: bf16[128,128], index: 24, kind: input, shape index: {}]   ;;  %s3724_s25 = inlined_call_operand.vmem [shape: f32[1,128], index: 25, kind: input, shape index: {}]   ;;  %s3725_s26 = inlined_call_operand.hbm [shape: bf16[128,128], index: 26, kind: input, shape index: {}]   ;;  %s3726_s27 = inlined_call_operand.vmem [shape: f32[1,128], index: 27, kind: input, shape index: {}]   ;;  %s3727_s28 = inlined_call_operand.hbm [shape: f32[8,128], index: 28, kind: output, shape index: {}]  }
   0x1   :  { %3742 = sst [smem:[#allocation48_spill]] %s3699_s0 }
   0x2   :  { %3743 = sst [smem:[#allocation49_spill]] %s3700_s1 }
   0x3   :  { %3744 = sst [smem:[#allocation50_spill]] %s3701_s2 }
   0x4   :  { %3745 = sst [smem:[#allocation51_spill]] %s3702_s3 }
   0x5   :  { %3746 = sst [smem:[#allocation52_spill]] %s3703_s4 }
   0x6   :  { %3747 = sst [smem:[#allocation53_spill]] %s3704_s5 }
   0x7   :  { %3748 = sst [smem:[#allocation54_spill]] %s3705_s6 }
   0x8   :  { %3749 = sst [smem:[#allocation55_spill]] %s3706_s7 }
   0x9   :  { %3750 = sst [smem:[#allocation56_spill]] %s3707_s8 }
   0xa   :  { %3751 = sst [smem:[#allocation57_spill]] %s3708_s9 }
   0xb   :  { %3752 = sst [smem:[#allocation58_spill]] %s3709_s10 }
   0xc   :  { %3753 = sst [smem:[#allocation59_spill]] %s3710_s11 }
   0xd   :  { %3754 = sst [smem:[#allocation60_spill]] %s3711_s12 }
   0xe   :  { %3755 = sst [smem:[#allocation61_spill]] %s3724_s25 }
   0xf   :  { %3756 = sst [smem:[#allocation62_spill]] %s3726_s27 }
  0x10   :  { %3757 = sst [smem:[#allocation63_spill]] %s3727_s28 }
  0x11   :  { %33 = vsyncpa [#allocation3], 0 }
  0x12   :  { %34 = vsyncpa [#allocation6], 0 }
  0x13   :  { %35 = vsyncpa [#allocation9], 0 }
  0x14   :  { %36 = vsyncpa [#allocation12], 0 }
  0x15   :  { %37 = vsyncpa [#allocation15], 0 }
  0x16   :  { %38 = vsyncpa [#allocation18], 0 }
  0x17   :  { %39 = vsyncpa [#allocation21], 0 }
  0x18   :  { %40 = vsyncpa [#allocation24], 0 }
  0x19   :  { %41 = vsyncpa [#allocation27], 0 }
  0x1a   :  { %42 = vsyncpa [#allocation30], 0 }
  0x1b   :  { %43 = vsyncpa [#allocation33], 0 }
  0x1c   :  { %44 = vsyncpa [#allocation4], 0  ;;  %s2914_s8 = smov [#allocation5]   ;;  %s2915_s9 = smov [#allocation8]  }
  0x1d   :  { %s62_s5 = sshll.u32 %s2914_s8, 4  ;;  %s89_s30 = sshll.u32 %s2915_s9, 4  ;;  %s63_s5 = int_to_ptr.vmem [resolvable:$true] %s62_s5  ;;  %s3092_s30 = int_to_ptr.vmem [resolvable:$true] %s89_s30 }
  0x1e   :  { %s3758_s10 = sld [smem:[#allocation49_spill]] }
  0x24   :  { %s2382_s0 = scalar_lea.hbm %s3758_s10, 512 }
  0x25   :  { %p2383_p0 = scmp.ne.s32.totalorder %s3758_s10, %s2382_s0  ;;  %p2386_p1 = scmp.lt.u32.totalorder %s2382_s0, %s3758_s10 }
  0x27   :  { %p2388_p2 = pnand %p2386_p1, %p2383_p0 }
  0x29   :  { %2391 = shalt.err (!%p2388_p2)
}
  0x2a   :  { %s2392_s12 = scalar_lea.vmem %s63_s5, 512  ;;  %p2397_p4 = scmp.lt.s32.totalorder %s63_s5, %s63_s5 }
  0x2b   :  { %p2393_p3 = scmp.ne.s32.totalorder %s63_s5, %s2392_s12  ;;  %p2398_p5 = scmp.lt.s32.totalorder %s2392_s12, %s2392_s12 }
  0x2d   :  { %p2399_p6 = por %p2398_p5, %p2397_p4 }
  0x2f   :  { %p2400_p7 = pnand %p2399_p6, %p2393_p3 }
  0x31   :  { %2403 = shalt.err (!%p2400_p7)
}
  0x32   :  { %s3739_s1 = smov 128   ;;  %s3740_s4 = smov 8  }
  0x33   :  { %68 = dma.hbm_to_vmem [thread:$0]  %s3758_s10, 512, %s63_s5, [#allocation6], %s3739_s1, %s3739_s1, %s3740_s4  }
  0x34   :  { %s3759_s0 = sld [smem:[#allocation53_spill]] }
  0x3a   :  { %s2404_s11 = scalar_lea.hbm %s3759_s0, 16 }
  0x3b   :  { %p2405_p8 = scmp.ne.s32.totalorder %s3759_s0, %s2404_s11  ;;  %p2408_p9 = scmp.lt.u32.totalorder %s2404_s11, %s3759_s0 }
  0x3d   :  { %p2410_p10 = pnand %p2408_p9, %p2405_p8 }
  0x3f   :  { %2413 = shalt.err (!%p2410_p10)
}
  0x40   :  { %s2414_s8 = scalar_lea.vmem %s3092_s30, 16  ;;  %s2418_s5 = scalar_lea.vmem %s3092_s30, 32 }
  0x41   :  { %p2415_p11 = scmp.ne.s32.totalorder %s3092_s30, %s2414_s8  ;;  %p2419_p12 = scmp.lt.s32.totalorder %s3092_s30, %s3092_s30 }
  0x42   :  { %p2420_p13 = scmp.lt.s32.totalorder %s2418_s5, %s2414_s8 }
  0x44   :  { %p2421_p0 = por %p2420_p13, %p2419_p12 }
  0x46   :  { %p2422_p1 = pnand %p2421_p0, %p2415_p11 }
  0x48   :  { %2425 = shalt.err (!%p2422_p1)
}
  0x49   :  { %92 = dma.hbm_to_vmem [thread:$0]  %s3759_s0, 16, %s3092_s30, [#allocation9]  }
  0x4a   :  { %s2918_s3 = smov [#allocation11]   ;;  %s3760_s2 = sld [smem:[#allocation57_spill]] }
  0x4b   :  { %s112_s6 = sshll.u32 %s2918_s3, 4  ;;  %s113_s6 = int_to_ptr.vmem [resolvable:$true] %s112_s6 }
  0x50   :  { %s2426_s7 = scalar_lea.hbm %s3760_s2, 1024 }
  0x51   :  { %p2427_p2 = scmp.ne.s32.totalorder %s3760_s2, %s2426_s7  ;;  %p2430_p3 = scmp.lt.u32.totalorder %s2426_s7, %s3760_s2 }
  0x53   :  { %p2432_p4 = pnand %p2430_p3, %p2427_p2 }
  0x55   :  { %2435 = shalt.err (!%p2432_p4)
}
  0x56   :  { %s2436_s4 = scalar_lea.vmem %s113_s6, 1024  ;;  %p2441_p6 = scmp.lt.s32.totalorder %s113_s6, %s113_s6 }
  0x57   :  { %p2437_p5 = scmp.ne.s32.totalorder %s113_s6, %s2436_s4  ;;  %p2442_p7 = scmp.lt.s32.totalorder %s2436_s4, %s2436_s4 }
  0x59   :  { %p2443_p8 = por %p2442_p7, %p2441_p6 }
  0x5b   :  { %p2444_p9 = pnand %p2443_p8, %p2437_p5 }
  0x5d   :  { %2447 = shalt.err (!%p2444_p9)
}
  0x5e   :  { %s2919_s30 = smov 64   ;;  %s2920_s0 = smov 4  }
  0x5f   :  { %118 = dma.hbm_to_vmem [thread:$0]  %s3760_s2, 1024, %s113_s6, [#allocation12], %s2919_s30, %s2919_s30, %s2920_s0  }
  0x60   :  { %s2921_s9 = smov [#allocation14]   ;;  %s2922_s11 = smov [#allocation17]  }
  0x61   :  { %s134_s3 = sshll.u32 %s2921_s9, 4  ;;  %s156_s29 = sshll.u32 %s2922_s11, 4  ;;  %s135_s3 = int_to_ptr.vmem [resolvable:$true] %s134_s3  ;;  %s157_s29 = int_to_ptr.vmem [resolvable:$true] %s156_s29 }
  0x62   :  { %s3761_s4 = sld [smem:[#allocation59_spill]] }
  0x68   :  { %s2448_s8 = scalar_lea.hbm %s3761_s4, 1024 }
  0x69   :  { %p2449_p10 = scmp.ne.s32.totalorder %s3761_s4, %s2448_s8  ;;  %p2452_p11 = scmp.lt.u32.totalorder %s2448_s8, %s3761_s4 }
  0x6b   :  { %p2454_p12 = pnand %p2452_p11, %p2449_p10 }
  0x6d   :  { %2457 = shalt.err (!%p2454_p12)
}
  0x6e   :  { %s2458_s6 = scalar_lea.vmem %s135_s3, 1024  ;;  %p2463_p0 = scmp.lt.s32.totalorder %s135_s3, %s135_s3 }
  0x6f   :  { %p2459_p13 = scmp.ne.s32.totalorder %s135_s3, %s2458_s6  ;;  %p2464_p1 = scmp.lt.s32.totalorder %s2458_s6, %s2458_s6 }
  0x71   :  { %p2465_p2 = por %p2464_p1, %p2463_p0 }
  0x73   :  { %p2466_p3 = pnand %p2465_p2, %p2459_p13 }
  0x75   :  { %2469 = shalt.err (!%p2466_p3)
}
  0x76   :  { %140 = dma.hbm_to_vmem [thread:$0]  %s3761_s4, 1024, %s135_s3, [#allocation15], %s2919_s30, %s2919_s30, %s2920_s0  }
  0x77   :  { %s2470_s27 = scalar_lea.hbm %s3712_s13, 3072 }
  0x78   :  { %p2471_p4 = scmp.ne.s32.totalorder %s3712_s13, %s2470_s27  ;;  %p2474_p5 = scmp.lt.u32.totalorder %s2470_s27, %s3712_s13 }
  0x7a   :  { %p2476_p6 = pnand %p2474_p5, %p2471_p4 }
  0x7c   :  { %2479 = shalt.err (!%p2476_p6)
}
  0x7d   :  { %s2480_s12 = scalar_lea.vmem %s157_s29, 3072  ;;  %p2485_p8 = scmp.lt.s32.totalorder %s157_s29, %s157_s29 }
  0x7e   :  { %p2481_p7 = scmp.ne.s32.totalorder %s157_s29, %s2480_s12  ;;  %p2486_p9 = scmp.lt.s32.totalorder %s2480_s12, %s2480_s12 }
  0x80   :  { %p2487_p10 = por %p2486_p9, %p2485_p8 }
  0x82   :  { %p2488_p11 = pnand %p2487_p10, %p2481_p7 }
  0x84   :  { %2491 = shalt.err (!%p2488_p11)
}
  0x85   :  { %162 = dma.hbm_to_vmem [thread:$0]  %s3712_s13, 3072, %s157_s29, [#allocation18], %s2919_s30, %s2919_s30, %s2920_s0  }
  0x86   :  { %s2923_s8 = smov [#allocation20]   ;;  %s2492_s1 = scalar_lea.hbm %s3714_s15, 3072 }
  0x87   :  { %s180_s5 = sshll.u32 %s2923_s8, 4  ;;  %p2493_p12 = scmp.ne.s32.totalorder %s3714_s15, %s2492_s1  ;;  %s181_s5 = int_to_ptr.vmem [resolvable:$true] %s180_s5 }
  0x88   :  { %p2496_p13 = scmp.lt.u32.totalorder %s2492_s1, %s3714_s15 }
  0x8a   :  { %p2498_p0 = pnand %p2496_p13, %p2493_p12 }
  0x8c   :  { %2501 = shalt.err (!%p2498_p0)
}
  0x8d   :  { %s2502_s9 = scalar_lea.vmem %s181_s5, 3072  ;;  %p2507_p2 = scmp.lt.s32.totalorder %s181_s5, %s181_s5 }
  0x8e   :  { %p2503_p1 = scmp.ne.s32.totalorder %s181_s5, %s2502_s9  ;;  %p2508_p3 = scmp.lt.s32.totalorder %s2502_s9, %s2502_s9 }
  0x90   :  { %p2509_p4 = por %p2508_p3, %p2507_p2 }
  0x92   :  { %p2510_p5 = pnand %p2509_p4, %p2503_p1 }
  0x94   :  { %2513 = shalt.err (!%p2510_p5)
}
  0x95   :  { %186 = dma.hbm_to_vmem [thread:$0]  %s3714_s15, 3072, %s181_s5, [#allocation21], %s2919_s30, %s2919_s30, %s2920_s0  }
  0x96   :  { %s2924_s11 = smov [#allocation23]   ;;  %s2925_s12 = smov [#allocation26]  }
  0x97   :  { %s204_s7 = sshll.u32 %s2924_s11, 4  ;;  %s228_s3 = sshll.u32 %s2925_s12, 4  ;;  %s205_s7 = int_to_ptr.vmem [resolvable:$true] %s204_s7  ;;  %s3187_s3 = int_to_ptr.vmem [resolvable:$true] %s228_s3 }
  0x98   :  { %s2514_s6 = scalar_lea.hbm %s3716_s17, 48 }
  0x99   :  { %p2515_p6 = scmp.ne.s32.totalorder %s3716_s17, %s2514_s6  ;;  %p2518_p7 = scmp.lt.u32.totalorder %s2514_s6, %s3716_s17 }
  0x9b   :  { %p2520_p8 = pnand %p2518_p7, %p2515_p6 }
  0x9d   :  { %2523 = shalt.err (!%p2520_p8)
}
  0x9e   :  { %s2524_s15 = scalar_lea.vmem %s205_s7, 48  ;;  %s2528_s5 = scalar_lea.vmem %s205_s7, 64 }
  0x9f   :  { %p2525_p9 = scmp.ne.s32.totalorder %s205_s7, %s2524_s15  ;;  %p2529_p10 = scmp.lt.s32.totalorder %s205_s7, %s205_s7 }
  0xa0   :  { %p2530_p11 = scmp.lt.s32.totalorder %s2528_s5, %s2524_s15 }
  0xa2   :  { %p2531_p12 = por %p2530_p11, %p2529_p10 }
  0xa4   :  { %p2532_p13 = pnand %p2531_p12, %p2525_p9 }
  0xa6   :  { %2535 = shalt.err (!%p2532_p13)
}
  0xa7   :  { %s2926_s27 = smov 16   ;;  %s2927_s10 = smov 1  }
  0xa8   :  { %210 = dma.hbm_to_vmem [thread:$0]  %s3716_s17, 48, %s205_s7, [#allocation24], %s2926_s27, %s2926_s27, %s2927_s10  }
  0xa9   :  { %s2536_s12 = scalar_lea.hbm %s3718_s19, 1024 }
  0xaa   :  { %p2537_p0 = scmp.ne.s32.totalorder %s3718_s19, %s2536_s12  ;;  %p2540_p1 = scmp.lt.u32.totalorder %s2536_s12, %s3718_s19 }
  0xac   :  { %p2542_p2 = pnand %p2540_p1, %p2537_p0 }
  0xae   :  { %2545 = shalt.err (!%p2542_p2)
}
  0xaf   :  { %s2546_s1 = scalar_lea.vmem %s3187_s3, 1024  ;;  %p2551_p4 = scmp.lt.s32.totalorder %s3187_s3, %s3187_s3 }
  0xb0   :  { %p2547_p3 = scmp.ne.s32.totalorder %s3187_s3, %s2546_s1  ;;  %p2552_p5 = scmp.lt.s32.totalorder %s2546_s1, %s2546_s1 }
  0xb2   :  { %p2553_p6 = por %p2552_p5, %p2551_p4 }
  0xb4   :  { %p2554_p7 = pnand %p2553_p6, %p2547_p3 }
  0xb6   :  { %2557 = shalt.err (!%p2554_p7)
}
  0xb7   :  { %234 = dma.hbm_to_vmem [thread:$0]  %s3718_s19, 1024, %s3187_s3, [#allocation27], %s2919_s30, %s2919_s30, %s2920_s0  }
  0xb8   :  { %s2928_s28 = smov [#allocation29]   ;;  %s2929_s15 = smov [#allocation32]  }
  0xb9   :  { %s250_s25 = sshll.u32 %s2928_s28, 4  ;;  %s274_s5 = sshll.u32 %s2929_s15, 4  ;;  %s251_s25 = int_to_ptr.vmem [resolvable:$true] %s250_s25  ;;  %s3224_s5 = int_to_ptr.vmem [resolvable:$true] %s274_s5 }
  0xba   :  { %s2558_s29 = scalar_lea.hbm %s3720_s21, 1024 }
  0xbb   :  { %p2559_p8 = scmp.ne.s32.totalorder %s3720_s21, %s2558_s29  ;;  %p2562_p9 = scmp.lt.u32.totalorder %s2558_s29, %s3720_s21 }
  0xbd   :  { %p2564_p10 = pnand %p2562_p9, %p2559_p8 }
  0xbf   :  { %2567 = shalt.err (!%p2564_p10)
}
  0xc0   :  { %s2568_s19 = scalar_lea.vmem %s251_s25, 1024  ;;  %p2573_p12 = scmp.lt.s32.totalorder %s251_s25, %s251_s25 }
  0xc1   :  { %p2569_p11 = scmp.ne.s32.totalorder %s251_s25, %s2568_s19  ;;  %p2574_p13 = scmp.lt.s32.totalorder %s2568_s19, %s2568_s19 }
  0xc3   :  { %p2575_p0 = por %p2574_p13, %p2573_p12 }
  0xc5   :  { %p2576_p1 = pnand %p2575_p0, %p2569_p11 }
  0xc7   :  { %2579 = shalt.err (!%p2576_p1)
}
  0xc8   :  { %256 = dma.hbm_to_vmem [thread:$0]  %s3720_s21, 1024, %s251_s25, [#allocation30], %s2919_s30, %s2919_s30, %s2920_s0  }
  0xc9   :  { %s2580_s17 = scalar_lea.hbm %s3723_s24, 1024 }
  0xca   :  { %p2581_p2 = scmp.ne.s32.totalorder %s3723_s24, %s2580_s17  ;;  %p2584_p3 = scmp.lt.u32.totalorder %s2580_s17, %s3723_s24 }
  0xcc   :  { %p2586_p4 = pnand %p2584_p3, %p2581_p2 }
  0xce   :  { %2589 = shalt.err (!%p2586_p4)
}
  0xcf   :  { %s2590_s13 = scalar_lea.vmem %s3224_s5, 1024  ;;  %p2595_p6 = scmp.lt.s32.totalorder %s3224_s5, %s3224_s5 }
  0xd0   :  { %p2591_p5 = scmp.ne.s32.totalorder %s3224_s5, %s2590_s13  ;;  %p2596_p7 = scmp.lt.s32.totalorder %s2590_s13, %s2590_s13 }
  0xd2   :  { %p2597_p8 = por %p2596_p7, %p2595_p6 }
  0xd4   :  { %p2598_p9 = pnand %p2597_p8, %p2591_p5 }
  0xd6   :  { %2601 = shalt.err (!%p2598_p9)
}
  0xd7   :  { %280 = dma.hbm_to_vmem [thread:$0]  %s3723_s24, 1024, %s3224_s5, [#allocation33], %s2919_s30, %s2919_s30, %s2920_s0  }
  0xd8   :  { %s2930_s29 = smov [#allocation2]   ;;  %s2931_s12 = smov [#allocation7]  }
  0xd9   :  { %s50_s11 = sshll.u32 %s2930_s29, 4  ;;  %s75_s4 = sshll.u32 %s2931_s12, 4  ;;  %s51_s11 = int_to_ptr.vmem [resolvable:$true] %s50_s11  ;;  %s76_s4 = int_to_ptr.vmem [resolvable:$true] %s75_s4 }
  0xda   :  { %s3762_s3 = sld [smem:[#allocation48_spill]] }
  0xe0   :  { %s2602_s6 = scalar_lea.hbm %s3762_s3, 256 }
  0xe1   :  { %p2603_p10 = scmp.ne.s32.totalorder %s3762_s3, %s2602_s6  ;;  %p2606_p11 = scmp.lt.u32.totalorder %s2602_s6, %s3762_s3 }
  0xe3   :  { %p2608_p12 = pnand %p2606_p11, %p2603_p10 }
  0xe5   :  { %2611 = shalt.err (!%p2608_p12)
}
  0xe6   :  { %s2612_s24 = scalar_lea.vmem %s51_s11, 256  ;;  %p2617_p0 = scmp.lt.s32.totalorder %s51_s11, %s51_s11 }
  0xe7   :  { %p2613_p13 = scmp.ne.s32.totalorder %s51_s11, %s2612_s24  ;;  %p2618_p1 = scmp.lt.s32.totalorder %s2612_s24, %s2612_s24 }
  0xe9   :  { %p2619_p2 = por %p2618_p1, %p2617_p0 }
  0xeb   :  { %p2620_p3 = pnand %p2619_p2, %p2613_p13 }
  0xed   :  { %2623 = shalt.err (!%p2620_p3)
}
  0xee   :  { %s3763_s5 = smov 8   ;;  %s3764_s28 = smov 128  }
  0xef   :  { %56 = dma.hbm_to_vmem [thread:$0]  %s3762_s3, 256, %s51_s11, [#allocation3], %s3764_s28, %s3764_s28, %s3763_s5  }
  0xf0   :  { %s3765_s25 = sld [smem:[#allocation50_spill]] }
  0xf6   :  { %s2624_s29 = scalar_lea.hbm %s3765_s25, 128 }
  0xf7   :  { %p2625_p4 = scmp.ne.s32.totalorder %s3765_s25, %s2624_s29  ;;  %p2628_p5 = scmp.lt.u32.totalorder %s2624_s29, %s3765_s25 }
  0xf9   :  { %p2630_p6 = pnand %p2628_p5, %p2625_p4 }
  0xfb   :  { %2633 = shalt.err (!%p2630_p6)
}
  0xfc   :  { %s2634_s2 = scalar_lea.vmem %s76_s4, 128  ;;  %p2639_p8 = scmp.lt.s32.totalorder %s76_s4, %s76_s4 }
  0xfd   :  { %p2635_p7 = scmp.ne.s32.totalorder %s76_s4, %s2634_s2  ;;  %p2640_p9 = scmp.lt.s32.totalorder %s2634_s2, %s2634_s2 }
  0xff   :  { %p2641_p10 = por %p2640_p9, %p2639_p8 }
 0x101   :  { %p2642_p11 = pnand %p2641_p10, %p2635_p7 }
 0x103   :  { %2645 = shalt.err (!%p2642_p11)
}
 0x104   :  { %78 = dma.hbm_to_vmem [thread:$0]  %s3765_s25, 128, %s76_s4, [#allocation6]  }
 0x105   :  { %s2932_s1 = smov [#allocation10]   ;;  %s2933_s7 = smov [#allocation13]  }
 0x106   :  { %s103_s17 = sshll.u32 %s2932_s1, 4  ;;  %s125_s24 = sshll.u32 %s2933_s7, 4  ;;  %s104_s17 = int_to_ptr.vmem [resolvable:$true] %s103_s17  ;;  %s126_s24 = int_to_ptr.vmem [resolvable:$true] %s125_s24 }
 0x107   :  { %s3766_s15 = sld [smem:[#allocation56_spill]] }
 0x10d   :  { %s2646_s9 = scalar_lea.hbm %s3766_s15, 16 }
 0x10e   :  { %p2647_p12 = scmp.ne.s32.totalorder %s3766_s15, %s2646_s9  ;;  %p2650_p13 = scmp.lt.u32.totalorder %s2646_s9, %s3766_s15 }
 0x110   :  { %p2652_p0 = pnand %p2650_p13, %p2647_p12 }
 0x112   :  { %2655 = shalt.err (!%p2652_p0)
}
 0x113   :  { %s2656_s4 = scalar_lea.vmem %s104_s17, 16  ;;  %s2660_s25 = scalar_lea.vmem %s104_s17, 32 }
 0x114   :  { %p2657_p1 = scmp.ne.s32.totalorder %s104_s17, %s2656_s4  ;;  %p2661_p2 = scmp.lt.s32.totalorder %s104_s17, %s104_s17 }
 0x115   :  { %p2662_p3 = scmp.lt.s32.totalorder %s2660_s25, %s2656_s4 }
 0x117   :  { %p2663_p4 = por %p2662_p3, %p2661_p2 }
 0x119   :  { %p2664_p5 = pnand %p2663_p4, %p2657_p1 }
 0x11b   :  { %2667 = shalt.err (!%p2664_p5)
}
 0x11c   :  { %106 = dma.hbm_to_vmem [thread:$0]  %s3766_s15, 16, %s104_s17, [#allocation9]  }
 0x11d   :  { %s3767_s11 = sld [smem:[#allocation58_spill]] }
 0x123   :  { %s2668_s3 = scalar_lea.hbm %s3767_s11, 16 }
 0x124   :  { %p2669_p6 = scmp.ne.s32.totalorder %s3767_s11, %s2668_s3  ;;  %p2672_p7 = scmp.lt.u32.totalorder %s2668_s3, %s3767_s11 }
 0x126   :  { %p2674_p8 = pnand %p2672_p7, %p2669_p6 }
 0x128   :  { %2677 = shalt.err (!%p2674_p8)
}
 0x129   :  { %s2678_s9 = scalar_lea.vmem %s126_s24, 16  ;;  %s2682_s13 = scalar_lea.vmem %s126_s24, 32 }
 0x12a   :  { %p2679_p9 = scmp.ne.s32.totalorder %s126_s24, %s2678_s9  ;;  %p2683_p10 = scmp.lt.s32.totalorder %s126_s24, %s126_s24 }
 0x12b   :  { %p2684_p11 = scmp.lt.s32.totalorder %s2682_s13, %s2678_s9 }
 0x12d   :  { %p2685_p12 = por %p2684_p11, %p2683_p10 }
 0x12f   :  { %p2686_p13 = pnand %p2685_p12, %p2679_p9 }
 0x131   :  { %2689 = shalt.err (!%p2686_p13)
}
 0x132   :  { %128 = dma.hbm_to_vmem [thread:$0]  %s3767_s11, 16, %s126_s24, [#allocation12]  }
 0x133   :  { %s2934_s21 = smov [#allocation16]   ;;  %s2935_s12 = smov [#allocation19]  }
 0x134   :  { %s147_s29 = sshll.u32 %s2934_s21, 4  ;;  %s168_s4 = sshll.u32 %s2935_s12, 4  ;;  %s148_s29 = int_to_ptr.vmem [resolvable:$true] %s147_s29  ;;  %s3312_s4 = int_to_ptr.vmem [resolvable:$true] %s168_s4 }
 0x135   :  { %s3768_s19 = sld [smem:[#allocation60_spill]] }
 0x13b   :  { %s2690_s6 = scalar_lea.hbm %s3768_s19, 16 }
 0x13c   :  { %p2691_p0 = scmp.ne.s32.totalorder %s3768_s19, %s2690_s6  ;;  %p2694_p1 = scmp.lt.u32.totalorder %s2690_s6, %s3768_s19 }
 0x13e   :  { %p2696_p2 = pnand %p2694_p1, %p2691_p0 }
 0x140   :  { %2699 = shalt.err (!%p2696_p2)
}
 0x141   :  { %s2700_s24 = scalar_lea.vmem %s148_s29, 16  ;;  %s2704_s11 = scalar_lea.vmem %s148_s29, 32 }
 0x142   :  { %p2701_p3 = scmp.ne.s32.totalorder %s148_s29, %s2700_s24  ;;  %p2705_p4 = scmp.lt.s32.totalorder %s148_s29, %s148_s29 }
 0x143   :  { %p2706_p5 = scmp.lt.s32.totalorder %s2704_s11, %s2700_s24 }
 0x145   :  { %p2707_p6 = por %p2706_p5, %p2705_p4 }
 0x147   :  { %p2708_p7 = pnand %p2707_p6, %p2701_p3 }
 0x149   :  { %2711 = shalt.err (!%p2708_p7)
}
 0x14a   :  { %150 = dma.hbm_to_vmem [thread:$0]  %s3768_s19, 16, %s148_s29, [#allocation15]  }
 0x14b   :  { %s2712_s17 = scalar_lea.hbm %s3713_s14, 48 }
 0x14c   :  { %p2713_p8 = scmp.ne.s32.totalorder %s3713_s14, %s2712_s17  ;;  %p2716_p9 = scmp.lt.u32.totalorder %s2712_s17, %s3713_s14 }
 0x14e   :  { %p2718_p10 = pnand %p2716_p9, %p2713_p8 }
 0x150   :  { %2721 = shalt.err (!%p2718_p10)
}
 0x151   :  { %s2722_s8 = scalar_lea.vmem %s3312_s4, 48  ;;  %s2726_s29 = scalar_lea.vmem %s3312_s4, 64 }
 0x152   :  { %p2723_p11 = scmp.ne.s32.totalorder %s3312_s4, %s2722_s8  ;;  %p2727_p12 = scmp.lt.s32.totalorder %s3312_s4, %s3312_s4 }
 0x153   :  { %p2728_p13 = scmp.lt.s32.totalorder %s2726_s29, %s2722_s8 }
 0x155   :  { %p2729_p0 = por %p2728_p13, %p2727_p12 }
 0x157   :  { %p2730_p1 = pnand %p2729_p0, %p2723_p11 }
 0x159   :  { %2733 = shalt.err (!%p2730_p1)
}
 0x15a   :  { %174 = dma.hbm_to_vmem [thread:$0]  %s3713_s14, 48, %s3312_s4, [#allocation18], %s2926_s27, %s2926_s27, %s2927_s10  }
 0x15b   :  { %s2936_s2 = smov [#allocation22]   ;;  %s2937_s1 = smov [#allocation25]  }
 0x15c   :  { %s192_s3 = sshll.u32 %s2936_s2, 4  ;;  %s216_s7 = sshll.u32 %s2937_s1, 4  ;;  %s193_s3 = int_to_ptr.vmem [resolvable:$true] %s192_s3  ;;  %s3347_s7 = int_to_ptr.vmem [resolvable:$true] %s216_s7 }
 0x15d   :  { %s2734_s5 = scalar_lea.hbm %s3715_s16, 48 }
 0x15e   :  { %p2735_p2 = scmp.ne.s32.totalorder %s3715_s16, %s2734_s5  ;;  %p2738_p3 = scmp.lt.u32.totalorder %s2734_s5, %s3715_s16 }
 0x160   :  { %p2740_p4 = pnand %p2738_p3, %p2735_p2 }
 0x162   :  { %2743 = shalt.err (!%p2740_p4)
}
 0x163   :  { %s2744_s14 = scalar_lea.vmem %s193_s3, 48  ;;  %s2748_s4 = scalar_lea.vmem %s193_s3, 64 }
 0x164   :  { %p2745_p5 = scmp.ne.s32.totalorder %s193_s3, %s2744_s14  ;;  %p2749_p6 = scmp.lt.s32.totalorder %s193_s3, %s193_s3 }
 0x165   :  { %p2750_p7 = scmp.lt.s32.totalorder %s2748_s4, %s2744_s14 }
 0x167   :  { %p2751_p8 = por %p2750_p7, %p2749_p6 }
 0x169   :  { %p2752_p9 = pnand %p2751_p8, %p2745_p5 }
 0x16b   :  { %2755 = shalt.err (!%p2752_p9)
}
 0x16c   :  { %198 = dma.hbm_to_vmem [thread:$0]  %s3715_s16, 48, %s193_s3, [#allocation21], %s2926_s27, %s2926_s27, %s2927_s10  }
 0x16d   :  { %s2756_s8 = scalar_lea.hbm %s3717_s18, 48 }
 0x16e   :  { %p2757_p10 = scmp.ne.s32.totalorder %s3717_s18, %s2756_s8  ;;  %p2760_p11 = scmp.lt.u32.totalorder %s2756_s8, %s3717_s18 }
 0x170   :  { %p2762_p12 = pnand %p2760_p11, %p2757_p10 }
 0x172   :  { %2765 = shalt.err (!%p2762_p12)
}
 0x173   :  { %s2766_s1 = scalar_lea.vmem %s3347_s7, 48  ;;  %s2770_s16 = scalar_lea.vmem %s3347_s7, 64 }
 0x174   :  { %p2767_p13 = scmp.ne.s32.totalorder %s3347_s7, %s2766_s1  ;;  %p2771_p0 = scmp.lt.s32.totalorder %s3347_s7, %s3347_s7 }
 0x175   :  { %p2772_p1 = scmp.lt.s32.totalorder %s2770_s16, %s2766_s1 }
 0x177   :  { %p2773_p2 = por %p2772_p1, %p2771_p0 }
 0x179   :  { %p2774_p3 = pnand %p2773_p2, %p2767_p13 }
 0x17b   :  { %2777 = shalt.err (!%p2774_p3)
}
 0x17c   :  { %222 = dma.hbm_to_vmem [thread:$0]  %s3717_s18, 48, %s3347_s7, [#allocation24], %s2926_s27, %s2926_s27, %s2927_s10  }
 0x17d   :  { %s2938_s11 = smov [#allocation28]   ;;  %s2939_s28 = smov [#allocation31]  }
 0x17e   :  { %s241_s5 = sshll.u32 %s2938_s11, 4  ;;  %s263_s9 = sshll.u32 %s2939_s28, 4  ;;  %s242_s5 = int_to_ptr.vmem [resolvable:$true] %s241_s5  ;;  %s264_s9 = int_to_ptr.vmem [resolvable:$true] %s263_s9 }
 0x17f   :  { %s2778_s14 = scalar_lea.hbm %s3719_s20, 16 }
 0x180   :  { %p2779_p4 = scmp.ne.s32.totalorder %s3719_s20, %s2778_s14  ;;  %p2782_p5 = scmp.lt.u32.totalorder %s2778_s14, %s3719_s20 }
 0x182   :  { %p2784_p6 = pnand %p2782_p5, %p2779_p4 }
 0x184   :  { %2787 = shalt.err (!%p2784_p6)
}
 0x185   :  { %s2788_s18 = scalar_lea.vmem %s242_s5, 16  ;;  %s2792_s27 = scalar_lea.vmem %s242_s5, 32 }
 0x186   :  { %p2789_p7 = scmp.ne.s32.totalorder %s242_s5, %s2788_s18  ;;  %p2793_p8 = scmp.lt.s32.totalorder %s242_s5, %s242_s5 }
 0x187   :  { %p2794_p9 = scmp.lt.s32.totalorder %s2792_s27, %s2788_s18 }
 0x189   :  { %p2795_p10 = por %p2794_p9, %p2793_p8 }
 0x18b   :  { %p2796_p11 = pnand %p2795_p10, %p2789_p7 }
 0x18d   :  { %2799 = shalt.err (!%p2796_p11)
}
 0x18e   :  { %244 = dma.hbm_to_vmem [thread:$0]  %s3719_s20, 16, %s242_s5, [#allocation27]  }
 0x18f   :  { %s2800_s29 = scalar_lea.hbm %s3721_s22, 16 }
 0x190   :  { %p2801_p12 = scmp.ne.s32.totalorder %s3721_s22, %s2800_s29  ;;  %p2804_p13 = scmp.lt.u32.totalorder %s2800_s29, %s3721_s22 }
 0x192   :  { %p2806_p0 = pnand %p2804_p13, %p2801_p12 }
 0x194   :  { %2809 = shalt.err (!%p2806_p0)
}
 0x195   :  { %s2810_s16 = scalar_lea.vmem %s264_s9, 16  ;;  %s2814_s3 = scalar_lea.vmem %s264_s9, 32 }
 0x196   :  { %p2811_p1 = scmp.ne.s32.totalorder %s264_s9, %s2810_s16  ;;  %p2815_p2 = scmp.lt.s32.totalorder %s264_s9, %s264_s9 }
 0x197   :  { %p2816_p3 = scmp.lt.s32.totalorder %s2814_s3, %s2810_s16 }
 0x199   :  { %p2817_p4 = por %p2816_p3, %p2815_p2 }
 0x19b   :  { %p2818_p5 = pnand %p2817_p4, %p2811_p1 }
 0x19d   :  { %2821 = shalt.err (!%p2818_p5)
}
 0x19e   :  { %266 = dma.hbm_to_vmem [thread:$0]  %s3721_s22, 16, %s264_s9, [#allocation30]  }
 0x19f   :  { %s2940_s11 = smov [#allocation34]   ;;  %s2822_s17 = scalar_lea.hbm %s3725_s26, 1024 }
 0x1a0   :  { %s288_s5 = sshll.u32 %s2940_s11, 4  ;;  %p2823_p6 = scmp.ne.s32.totalorder %s3725_s26, %s2822_s17  ;;  %s289_s5 = int_to_ptr.vmem [resolvable:$true] %s288_s5 }
 0x1a1   :  { %p2826_p7 = scmp.lt.u32.totalorder %s2822_s17, %s3725_s26 }
 0x1a3   :  { %p2828_p8 = pnand %p2826_p7, %p2823_p6 }
 0x1a5   :  { %2831 = shalt.err (!%p2828_p8)
}
 0x1a6   :  { %s2832_s12 = scalar_lea.vmem %s289_s5, 1024  ;;  %p2837_p10 = scmp.lt.s32.totalorder %s289_s5, %s289_s5 }
 0x1a7   :  { %p2833_p9 = scmp.ne.s32.totalorder %s289_s5, %s2832_s12  ;;  %p2838_p11 = scmp.lt.s32.totalorder %s2832_s12, %s2832_s12 }
 0x1a9   :  { %p2839_p12 = por %p2838_p11, %p2837_p10 }
 0x1ab   :  { %p2840_p13 = pnand %p2839_p12, %p2833_p9 }
 0x1ad   :  { %2843 = shalt.err (!%p2840_p13)
}
 0x1ae   :  { %294 = dma.hbm_to_vmem [thread:$0]  %s3725_s26, 1024, %s289_s5, [#allocation33], %s2919_s30, %s2919_s30, %s2920_s0  }
 0x1af   :  { %2878 = dma.done.wait [#allocation3], 256  }
 0x1b0   :  { %2879 = vsyncadd [#allocation3], 4294967040 }
 0x1b1   :  { %2880 = dma.done.wait [#allocation6], 640  }
 0x1b2   :  { %2881 = vsyncadd [#allocation6], 4294966656 }
 0x1b3   :  { %2882 = dma.done.wait [#allocation9], 32  }
 0x1b4   :  { %2883 = vsyncadd [#allocation9], 4294967264 }
 0x1b5   :  { %2884 = dma.done.wait [#allocation12], 1040  }
 0x1b6   :  { %2885 = vsyncadd [#allocation12], 4294966256 }
 0x1b7   :  { %2886 = dma.done.wait [#allocation15], 1040  }
 0x1b8   :  { %2887 = vsyncadd [#allocation15], 4294966256 }
 0x1b9   :  { %2888 = dma.done.wait [#allocation18], 3120  }
 0x1ba   :  { %2889 = vsyncadd [#allocation18], 4294964176 }
 0x1bb   :  { %2890 = dma.done.wait [#allocation21], 3120  }
 0x1bc   :  { %2891 = vsyncadd [#allocation21], 4294964176 }
 0x1bd   :  { %2892 = dma.done.wait [#allocation24], 96  }
 0x1be   :  { %2893 = vsyncadd [#allocation24], 4294967200 }
 0x1bf   :  { %2894 = dma.done.wait [#allocation27], 1040  }
 0x1c0   :  { %2895 = vsyncadd [#allocation27], 4294966256 }
 0x1c1   :  { %2896 = dma.done.wait [#allocation30], 1040  }
 0x1c2   :  { %2897 = vsyncadd [#allocation30], 4294966256 }
 0x1c3   :  { %2898 = dma.done.wait [#allocation33], 2048  }
 0x1c4   :  { %2899 = vsyncadd [#allocation33], 4294965248  ;;  %v2941_v0 = vmov 0.0   ;;  %vm2942_vm0 = vmmov 0   ;;  %v2301_v1 = vld [vmem:[#allocation11] sm:$0xff]   ;;  %v2302_v2 = vld [vmem:[#allocation11 + $0x8] sm:$0xff]   ;;  %v361_v37 = vlaneseq }
 0x1c5   :  { %2022 = vmatprep.subr.bf16.mxu0 %v2941_v0  ;;  %2038 = vmatprep.mubr.msk.bf16.mxu0 %vm2942_vm0, %v2941_v0  ;;  %v2303_v3 = vld [vmem:[#allocation11 + $0x10] sm:$0xff]   ;;  %v2304_v4 = vld [vmem:[#allocation11 + $0x18] sm:$0xff]   ;;  %s3769_s0 = sld [smem:[#allocation55_spill]]  ;;  %v2305_v9 = vld [vmem:[#allocation11 + $0x20] sm:$0xff]   ;;  %s3770_s5 = sld [smem:[#allocation51_spill]]  ;;  %v2943_v36 = vmov 0  }
 0x1c6   :  { %2042 = vmatprep.subr.bf16.mxu1 %v2301_v1  ;;  %v532_v5 = vld [vmem:[#allocation5] sm:$0xff]  ;;  %v533_v6 = vld [vmem:[#allocation5 + $0x8] sm:$0xff]  ;;  %v2306_v11 = vld [vmem:[#allocation11 + $0x28] sm:$0xff]   ;;  %2300 = vset.pattern.permute.xlu1 %v2943_v36  ;;  %s3771_s4 = sld [smem:[#allocation52_spill]]  ;;  %v394_v42 = vshrl.u32 %v361_v37, 7  ;;  %s3516_s9 = smov 0  }
 0x1c7   :  { %2043 = vmatpush3.bf16.msra.mxu1 %v2301_v1  ;;  %v536_v7 = vpack.c.bf16 %v533_v6, %v532_v5  ;;  %v2307_v13 = vld [vmem:[#allocation11 + $0x30] sm:$0xff]   ;;  %v2308_v15 = vld [vmem:[#allocation11 + $0x38] sm:$0xff]   ;;  %v534_v17 = vld [vmem:[#allocation5 + $0x10] sm:$0xff]  ;;  %2299 = vset.pattern.permute.xlu0 %v2943_v36 }
 0x1c8   :  { %2044 = vmatprep.subr.bf16.mxu1 %v2302_v2  ;;  %v535_v18 = vld [vmem:[#allocation5 + $0x18] sm:$0xff]  ;;  %v417_v23 = vld [vmem:[#allocation2] sm:$0xff]  ;;  %v2320_v29 = vld [vmem:[#allocation14 + $0x18] sm:$0xff]   ;;  %v395_v43 = vadd.s32 8, %v394_v42 }
 0x1c9   :  { %2058 = vmatprep.mubr.bf16.mxu1 %v536_v7  ;;  %v537_v20 = vpack.c.bf16 %v535_v18, %v534_v17  ;;  %v418_v24 = vld [vmem:[#allocation2 + $0x8] sm:$0xff]  ;;  %v2317_v25 = vld [vmem:[#allocation14] sm:$0xff]   ;;  %v2324_v33 = vld [vmem:[#allocation14 + $0x38] sm:$0xff]  }
 0x1ca   :  { %v419_v26 = vpack.c.bf16 %v418_v24, %v417_v23  ;;  %v2318_v27 = vld [vmem:[#allocation14 + $0x8] sm:$0xff]   ;;  %v2319_v28 = vld [vmem:[#allocation14 + $0x10] sm:$0xff]   ;;  %v2321_v30 = vld [vmem:[#allocation14 + $0x20] sm:$0xff]  }
 0x1cb   :  { %2045 = vmatpush3.bf16.msra.mxu1 %v2302_v2  ;;  %v2309_v8 = vld [vmem:[%s3769_s0] sm:$0xff]   ;;  %v2310_v10 = vld [vmem:[%s3769_s0 + $0x8] sm:$0xff]   ;;  %v2311_v12 = vld [vmem:[%s3769_s0 + $0x10] sm:$0xff]  }
 0x1cc   :  { %2046 = vmatprep.subr.bf16.mxu1 %v2303_v3  ;;  %2023 = vmatpush3.bf16.msra.mxu0 %v2309_v8  ;;  %v2312_v14 = vld [vmem:[%s3769_s0 + $0x18] sm:$0xff]   ;;  %v2313_v16 = vld [vmem:[%s3769_s0 + $0x20] sm:$0xff]   ;;  %v2314_v19 = vld [vmem:[%s3769_s0 + $0x28] sm:$0xff]  }
 0x1cd   :  { %2024 = vmatprep.subr.bf16.mxu0 %v2941_v0  ;;  %v2315_v21 = vld [vmem:[%s3769_s0 + $0x30] sm:$0xff]   ;;  %v2316_v22 = vld [vmem:[%s3769_s0 + $0x38] sm:$0xff]   ;;  %v2322_v31 = vld [vmem:[#allocation14 + $0x28] sm:$0xff]  }
 0x1ce   :  { %v2323_v32 = vld [vmem:[#allocation14 + $0x30] sm:$0xff]   ;;  %v363_v35 = vld [vmem:[%s3770_s5] sm:$0xff]  ;;  %v1820_v39 = vld [vmem:[#allocation8] ss:$0 sm:$0xff] }
 0x1cf   :  { %2047 = vmatpush3.bf16.msra.mxu1 %v2303_v3  ;;  %v365_v34 = vld [vmem:[%s3770_s5 + $0x10] sm:$0xff]  ;;  %368 = vperm.xlu0 %2299, %v363_v35   ;;  %v1817_v38 = vld [vmem:[%s3771_s4] ss:$0 sm:$0xff]  ;;  %v366_v40 = vld [vmem:[%s3770_s5 + $0x18] sm:$0xff]  ;;  %vm413_vm2 = vcmp.eq.s32.totalorder %v394_v42, %v1820_v39  ;;  %v362_v3 = vand.u32 127, %v361_v37 }
 0x1d0   :  { %2048 = vmatprep.subr.bf16.mxu1 %v2304_v4  ;;  %2025 = vmatpush3.bf16.msra.mxu0 %v2310_v10  ;;  %v364_v41 = vld [vmem:[%s3770_s5 + $0x8] sm:$0xff]  ;;  %vm401_vm1 = vcmp.eq.s32.totalorder %v394_v42, %v1817_v38  ;;  %v3479_v45 = vsel %vm413_vm2, 1.0, %v2941_v0  ;;  %vm402_vm3 = vcmp.eq.s32.totalorder %v395_v43, %v1817_v38  ;;  %v1831_v49 = vld [vmem:[#allocation13] ss:$0 sm:$0xff]  ;;  %v1822_v63 = vld [vmem:[#allocation10] ss:$0 sm:$0xff] }
 0x1d1   :  { %2026 = vmatprep.subr.bf16.mxu0 %v2941_v0  ;;  %374 = vperm.xlu1 %2300, %v365_v34   ;;  %v3476_v44 = vsel %vm401_vm1, 1.0, %v2941_v0  ;;  %v416_v46 = vpack.c.bf16 %v3479_v45, %v3479_v45  ;;  %v3484_v47 = vsel %vm402_vm3, 1.0, %v2941_v0 }
 0x1d2   :  { %v407_v48 = vpack.c.bf16 %v3484_v47, %v3476_v44 }
 0x1d3   :  { %2049 = vmatpush3.bf16.msra.mxu1 %v2304_v4  ;;  %371 = vperm.xlu0 %2299, %v364_v41  }
 0x1d4   :  { %2050 = vmatprep.subr.bf16.mxu1 %v2305_v9  ;;  %2027 = vmatpush3.bf16.msra.mxu0 %v2311_v12 }
 0x1d5   :  { %2028 = vmatprep.subr.bf16.mxu0 %v2941_v0  ;;  %377 = vperm.xlu1 %2300, %v366_v40  }
 0x1d7   :  { %2051 = vmatpush3.bf16.msra.mxu1 %v2305_v9 }
 0x1d8   :  { %2052 = vmatprep.subr.bf16.mxu1 %v2306_v11  ;;  %2029 = vmatpush3.bf16.msra.mxu0 %v2312_v14 }
 0x1d9   :  { %2030 = vmatprep.subr.bf16.mxu0 %v2941_v0 }
 0x1db   :  { %2053 = vmatpush3.bf16.msra.mxu1 %v2306_v11 }
 0x1dc   :  { %2054 = vmatprep.subr.bf16.mxu1 %v2307_v13  ;;  %2031 = vmatpush3.bf16.msra.mxu0 %v2313_v16 }
 0x1dd   :  { %2032 = vmatprep.subr.bf16.mxu0 %v2941_v0 }
 0x1df   :  { %2055 = vmatpush3.bf16.msra.mxu1 %v2307_v13 }
 0x1e0   :  { %2056 = vmatprep.subr.bf16.mxu1 %v2308_v15  ;;  %2033 = vmatpush3.bf16.msra.mxu0 %v2314_v19  ;;  %v1840_v19 = vld [vmem:[#allocation16] ss:$0 sm:$0xff] }
 0x1e1   :  { %2034 = vmatprep.subr.bf16.mxu0 %v2941_v0 }
 0x1e3   :  { %2057 = vmatpush3.bf16.msra.mxu1 %v2308_v15 }
 0x1e4   :  { %2035 = vmatpush3.bf16.msra.mxu0 %v2315_v21 }
 0x1e5   :  { %2036 = vmatprep.subr.bf16.mxu0 %v2941_v0 }
 0x1e6   :  { %2059 = vmatmul.mubr.bf16.vlgmr.msra.gmra.mrb[0].mxu1 %v537_v20 }
 0x1e8   :  { %2037 = vmatpush3.bf16.msra.mxu0 %v2316_v22 }
 0x1e9   :  { %2062 = vmatprep.subr.bf16.mxu0 %v2317_v25 }
 0x1eb   :  { %2039 = vmatmul.mubr.bf16.vlgmr.msra.gmra.mrb[0].mxu0 %v419_v26 }
 0x1ec   :  { %2063 = vmatpush3.bf16.msra.mxu0 %v2317_v25 }
 0x1ed   :  { %2064 = vmatprep.subr.bf16.mxu0 %v2318_v27 }
 0x1f0   :  { %2065 = vmatpush3.bf16.msra.mxu0 %v2318_v27 }
 0x1f1   :  { %2066 = vmatprep.subr.bf16.mxu0 %v2319_v28 }
 0x1f4   :  { %2067 = vmatpush3.bf16.msra.mxu0 %v2319_v28 }
 0x1f5   :  { %2068 = vmatprep.subr.bf16.mxu0 %v2320_v29 }
 0x1f8   :  { %2069 = vmatpush3.bf16.msra.mxu0 %v2320_v29 }
 0x1f9   :  { %2070 = vmatprep.subr.bf16.mxu0 %v2321_v30 }
 0x1fc   :  { %2071 = vmatpush3.bf16.msra.mxu0 %v2321_v30 }
 0x1fd   :  { %2072 = vmatprep.subr.bf16.mxu0 %v2322_v31 }
 0x200   :  { %2073 = vmatpush3.bf16.msra.mxu0 %v2322_v31 }
 0x201   :  { %2074 = vmatprep.subr.bf16.mxu0 %v2323_v32 }
 0x204   :  { %2075 = vmatpush3.bf16.msra.mxu0 %v2323_v32 }
 0x205   :  { %2076 = vmatprep.subr.bf16.mxu0 %v2324_v33 }
 0x208   :  { %2077 = vmatpush3.bf16.msra.mxu0 %v2324_v33 }
 0x24e   :  { %v369_v10 = vpop.permute.xlu0 %368 }
 0x24f   :  { %vm379_vm5 = vcmp.eq.s32.totalorder %v369_v10, %v362_v3 }
 0x250   :  { %v375_v9 = vpop.permute.xlu1 %374  ;;  %v3492_v13 = vsel %vm379_vm5, 1.0, %v2941_v0 }
 0x251   :  { %vm381_vm4 = vcmp.eq.s32.totalorder %v375_v9, %v362_v3 }
 0x252   :  { %v3489_v11 = vsel %vm381_vm4, 1.0, %v2941_v0  ;;  %v372_v14 = vpop.permute.xlu0 %371 }
 0x253   :  { %vm380_vm7 = vcmp.eq.s32.totalorder %v372_v14, %v362_v3 }
 0x254   :  { %v378_v12 = vpop.permute.xlu1 %377  ;;  %v3500_v17 = vsel %vm380_vm7, 1.0, %v2941_v0 }
 0x255   :  { %vm382_vm6 = vcmp.eq.s32.totalorder %v378_v12, %v362_v3  ;;  %v391_v18 = vpack.c.bf16 %v3500_v17, %v3492_v13 }
 0x256   :  { %v3495_v15 = vsel %vm382_vm6, 1.0, %v2941_v0 }
 0x257   :  { %v392_v16 = vpack.c.bf16 %v3495_v15, %v3489_v11 }
 0x2b9   :  { %v2060_v50 = vpop.f32.mrb[0].mxu1 }
 0x2ba   :  { %v652_v51 = vadd.f32 %v2060_v50, %v1831_v49  ;;  %v643_v52 = vpop.f32.mrb[1].mxu1 }
 0x2bb   :  { %v644_v53 = vadd.f32 %v1831_v49, %v643_v52  ;;  %v2061_v54 = vpop.f32.mrb[2].mxu1 }
 0x2bc   :  { %v655_v55 = vadd.f32 %v2061_v54, %v1831_v49  ;;  %v646_v56 = vpop.f32.mrb[3].mxu1  ;;  %v660_v58 = vmax.f32 %v652_v51, 0.0 }
 0x2bd   :  { %v647_v57 = vadd.f32 %v1831_v49, %v646_v56  ;;  %v658_v60 = vmax.f32 %v644_v53, 0.0 }
 0x2be   :  { %v661_v59 = vmax.f32 %v655_v55, 0.0  ;;  %v525_v2 = vpop.f32.mrb[0].mxu0 }
 0x2bf   :  { %v659_v61 = vmax.f32 %v647_v57, 0.0  ;;  %v526_v4 = vadd.f32 %v1822_v63, %v525_v2   ;;  %v2040_v5 = vpop.f32.mrb[1].mxu0 }
 0x2c0   :  { %v663_v62 = vpack.c.bf16 %v661_v59, %v660_v58  ;;  %v528_v6 = vpop.f32.mrb[2].mxu0 }
 0x2c1   :  { %v662_v1 = vpack.c.bf16 %v659_v61, %v658_v60  ;;  %v529_v7 = vadd.f32 %v1822_v63, %v528_v6   ;;  %v2041_v8 = vpop.f32.mrb[3].mxu0 }
 0x2c3   :  { %2078 = vmatprep.mubr.bf16.mxu0 %v662_v1 }
 0x2c4   :  { %2079 = vmatmul.mubr.bf16.vlgmr.msra.gmra.mrb[4].mxu0 %v663_v62 }
 0x397   :  { %v2080_v20 = vpop.f32.mrb[4].mxu0 }
 0x398   :  { %v3504_v21 = vadd.f32 %v2080_v20, %v1840_v19  ;;  %v769_v22 = vpop.f32.mrb[5].mxu0 }
 0x399   :  { %v3506_v23 = vadd.f32 %v1840_v19, %v769_v22  ;;  %v2081_v24 = vpop.f32.mrb[6].mxu0 }
 0x39a   :  { %v3508_v25 = vadd.f32 %v2081_v24, %v1840_v19  ;;  %v772_v26 = vpop.f32.mrb[7].mxu0 }
 0x39b   :  { %v3510_v27 = vadd.f32 %v1840_v19, %v772_v26 }
 0x39c LB: > { %vm793_vm8 = vcmask 130048   ;;  %v792_v28 = vpack.c.bf16 %v2904_v7, %v2908_v4  ;;  %v2944_v29 = vmov 0.0   ;;  %vm2945_vm9 = vmmov 0   ;;  %s1920_s26 = sshll.u32 %s2912_s9, 6  ;;  %s922_s18 = scalar_lea.vmem [#allocation19], %s2912_s9  ;;  %s2912_s9 = sphi %s3516_s9, %s789_s9   ;;  %v2908_v4 = vphi %v526_v4, %v3773_v4   ;;  %v2904_v7 = vphi %v529_v7, %v3772_v7  }
 0x39d   : > { %2084 = vmatprep.mubr.msk.bf16.mxu0 %vm793_vm8, %v391_v18  ;;  %2088 = vmatprep.subr.bf16.mxu1 %v2944_v29  ;;  %s3546_s30 = scalar_lea.vmem [#allocation17], %s1920_s26  ;;  %vm855_vm10 = vcmask 261120   ;;  %s1023_s0 = scalar_lea.vmem [#allocation20], %s1920_s26  ;;  %v1854_v14 = vld [vmem:[%s922_s18] ss:$0 sm:$0xff] }
 0x39e   : > { %2082 = vmatprep.subr.bf16.mxu0 %v792_v28  ;;  %2092 = vmatprep.mubr.msk.bf16.mxu1 %vm2945_vm9, %v2944_v29  ;;  %v2325_v30 = vld [vmem:[%s3546_s30] sm:$0xff]   ;;  %v2326_v31 = vld [vmem:[%s3546_s30 + $0x8] sm:$0xff]   ;;  %v2327_v32 = vld [vmem:[%s3546_s30 + $0x10] sm:$0xff]   ;;  %s1040_s27 = scalar_lea.vmem [#allocation22], %s2912_s9  ;;  %s1137_s10 = scalar_lea.vmem [#allocation23], %s2912_s9 }
 0x39f   : > { %2083 = vmatpush3.bf16.msra.mxu0 %v792_v28  ;;  %v2328_v33 = vld [vmem:[%s3546_s30 + $0x18] sm:$0xff]   ;;  %v2329_v34 = vld [vmem:[%s3546_s30 + $0x20] sm:$0xff]   ;;  %v2330_v35 = vld [vmem:[%s3546_s30 + $0x28] sm:$0xff]   ;;  %s1147_s7 = scalar_lea.vmem [#allocation25], %s2912_s9  ;;  %s789_s9 = sadd.s32 1, %s2912_s9  }
 0x3a0   : > { %2096 = vmatprep.subr.bf16.mxu0 %v2944_v29  ;;  %v2331_v56 = vld [vmem:[%s3546_s30 + $0x30] sm:$0xff]   ;;  %v2332_v57 = vld [vmem:[%s3546_s30 + $0x38] sm:$0xff]   ;;  %v2333_v58 = vld [vmem:[%s1023_s0] sm:$0xff]   ;;  %p786_p0 = scmp.ge.s32.totalorder %s789_s9, 3  }
 0x3a1   : > { %v2334_v59 = vld [vmem:[%s1023_s0 + $0x8] sm:$0xff]   ;;  %v2335_v60 = vld [vmem:[%s1023_s0 + $0x10] sm:$0xff]   ;;  %v2336_v61 = vld [vmem:[%s1023_s0 + $0x18] sm:$0xff]   ;;  %2341 = vset.pattern.permute.xlu0 (%p786_p0), %v2943_v36  ;;  %s3774_s29 = sld [smem:[#allocation54_spill]] (%p786_p0)  ;;  %s3775_s12 = sld [smem:[#allocation61_spill]] (%p786_p0) }
 0x3a2   : > { %2085 = vmatmul.mubr.msk.bf16.vlgmr.msra.gmra.mrb[0].mxu0 %vm793_vm8, %v392_v16  ;;  %v2337_v62 = vld [vmem:[%s1023_s0 + $0x20] sm:$0xff]   ;;  %v2338_v63 = vld [vmem:[%s1023_s0 + $0x28] sm:$0xff]   ;;  %v2339_v10 = vld [vmem:[%s1023_s0 + $0x30] sm:$0xff]   ;;  %s3776_s26 = sld [smem:[#allocation62_spill]] (%p786_p0)  ;;  %s2946_s30 = smov (%p786_p0), [#allocation35]  }
 0x3a3   : > { %2112 = vmatprep.mubr.msk.bf16.mxu0 %vm2945_vm9, %v2944_v29  ;;  %2097 = vmatpush3.bf16.msra.mxu0 %v2325_v30  ;;  %v2340_v12 = vld [vmem:[%s1023_s0 + $0x38] sm:$0xff]   ;;  %v2344_v44 = vld [vmem:[#allocation26 + $0x10] sm:$0xff] (%p786_p0)   ;;  %v2346_v36 = vld [vmem:[#allocation26 + $0x20] sm:$0xff] (%p786_p0)   ;;  %s1775_s0 = sshll.u32 (%p786_p0), %s2946_s30, 4  ;;  %s1776_s0 = int_to_ptr.vmem [resolvable:$true] %s1775_s0 }
 0x3a4   : > { %2098 = vmatprep.subr.bf16.mxu0 %v2944_v29  ;;  %v2350_v47 = vld [vmem:[#allocation29] sm:$0xff] (%p786_p0)   ;;  %v2351_v11 = vld [vmem:[#allocation29 + $0x8] sm:$0xff] (%p786_p0)   ;;  %v2352_v45 = vld [vmem:[#allocation29 + $0x10] sm:$0xff] (%p786_p0)   ;;  %s2844_s18 = scalar_lea.vmem (%p786_p0), %s1776_s0, 128  ;;  %p2849_p2 = scmp.lt.s32.totalorder (%p786_p0), %s1776_s0, %s1776_s0 }
 0x3a5   :  { %v2353_v13 = vld [vmem:[#allocation29 + $0x18] sm:$0xff] (%p786_p0)   ;;  %v2348_v15 = vld [vmem:[#allocation26 + $0x30] sm:$0xff] (%p786_p0)   ;;  %v2354_v16 = vld [vmem:[#allocation29 + $0x20] sm:$0xff] (%p786_p0)   ;;  %p2845_p1 = scmp.ne.s32.totalorder (%p786_p0), %s1776_s0, %s2844_s18  ;;  %p2850_p3 = scmp.lt.s32.totalorder (%p786_p0), %s2844_s18, %s2844_s18 }
 0x3a6   :  { %v2349_v17 = vld [vmem:[#allocation26 + $0x38] sm:$0xff] (%p786_p0)   ;;  %v1211_v18 = vld [vmem:[#allocation7] sm:$0xff] (%p786_p0) }
 0x3a7   : > { %2099 = vmatpush3.bf16.msra.mxu0 %v2326_v31  ;;  %v1864_v31 = vld [vmem:[%s1040_s27] ss:$0 sm:$0xff]  ;;  %p2851_p4 = por (%p786_p0), %p2850_p3, %p2849_p2 }
 0x3a8   : > { %2100 = vmatprep.subr.bf16.mxu0 %v2944_v29 }
 0x3a9   :  { %p2852_p5 = pnand (%p786_p0), %p2851_p4, %p2845_p1 }
 0x3ab   : > { %2101 = vmatpush3.bf16.msra.mxu0 %v2327_v32 }
 0x3ac   : > { %2102 = vmatprep.subr.bf16.mxu0 %v2944_v29 }
 0x3af   : > { %2103 = vmatpush3.bf16.msra.mxu0 %v2328_v33 }
 0x3b0   : > { %2104 = vmatprep.subr.bf16.mxu0 %v2944_v29 }
 0x3b3   : > { %2105 = vmatpush3.bf16.msra.mxu0 %v2329_v34 }
 0x3b4   : > { %2106 = vmatprep.subr.bf16.mxu0 %v2944_v29 }
 0x3b7   : > { %2107 = vmatpush3.bf16.msra.mxu0 %v2330_v35  ;;  %v1874_v35 = vld [vmem:[%s1147_s7] ss:$0 sm:$0xff] }
 0x3b8   : > { %2108 = vmatprep.subr.bf16.mxu0 %v2944_v29 }
 0x3bb   : > { %2109 = vmatpush3.bf16.msra.mxu0 %v2331_v56  ;;  %v2367_v56 = vld [vmem:[#allocation32 + $0x8] sm:$0xff] (%p786_p0)  }
 0x3bc   : > { %2110 = vmatprep.subr.bf16.mxu0 %v2944_v29 }
 0x3bf   : > { %2111 = vmatpush3.bf16.msra.mxu0 %v2332_v57  ;;  %v2368_v57 = vld [vmem:[#allocation32 + $0x10] sm:$0xff] (%p786_p0)  }
 0x3c0   :  { %2136 = vmatprep.subr.bf16.mxu0 (%p786_p0), %v2941_v0 }
 0x475   : > { %v2086_v37 = vpop.f32.mrb[0].mxu0 }
 0x476   : > { %v843_v38 = vadd.f32 %v2086_v37, %v3504_v21  ;;  %v834_v39 = vpop.f32.mrb[1].mxu0  ;;  %v2355_v21 = vld [vmem:[#allocation29 + $0x28] sm:$0xff] (%p786_p0)  }
 0x477   : > { %v835_v40 = vadd.f32 %v834_v39, %v3506_v23  ;;  %v2087_v41 = vpop.f32.mrb[2].mxu0  ;;  %v1212_v23 = vpack.c.bf16 (%p786_p0), %v1211_v18, %v1211_v18 }
 0x478   : > { %v846_v42 = vadd.f32 %v2087_v41, %v3508_v25  ;;  %v837_v43 = vpop.f32.mrb[3].mxu0  ;;  %v851_v50 = vmax.f32 %v843_v38, 0.0  ;;  %v2356_v25 = vld [vmem:[#allocation29 + $0x30] sm:$0xff] (%p786_p0)  }
 0x479   : > { %v838_v49 = vadd.f32 %v837_v43, %v3510_v27  ;;  %v849_v52 = vmax.f32 %v835_v40, 0.0  ;;  %v2357_v27 = vld [vmem:[#allocation29 + $0x38] sm:$0xff] (%p786_p0)  }
 0x47a   : > { %v852_v51 = vmax.f32 %v846_v42, 0.0 }
 0x47b   : > { %v850_v53 = vmax.f32 %v838_v49, 0.0 }
 0x47c   : > { %v854_v54 = vpack.c.bf16 %v852_v51, %v851_v50  ;;  %v2342_v51 = vld [vmem:[#allocation26] sm:$0xff] (%p786_p0)  }
 0x47d   : > { %v853_v55 = vpack.c.bf16 %v850_v53, %v849_v52  ;;  %v2343_v53 = vld [vmem:[#allocation26 + $0x8] sm:$0xff] (%p786_p0)  }
 0x47f   : > { %2089 = vmatpush3.bf16.msra.mxu1 %v853_v55  ;;  %v2366_v55 = vld [vmem:[#allocation32] sm:$0xff] (%p786_p0)  }
 0x480   : > { %2090 = vmatprep.subr.bf16.mxu1 %v2944_v29 }
 0x483   : > { %2091 = vmatpush3.bf16.msra.mxu1 %v854_v54  ;;  %v1204_v54 = vld [vmem:[%s3774_s29] sm:$0xff] (%p786_p0) }
 0x484   : > { %2116 = vmatprep.subr.bf16.mxu1 %v2944_v29  ;;  %1207 = vperm.xlu0 (%p786_p0), %2341, %v1204_v54  }
 0x486   : > { %2093 = vmatmul.mubr.msk.bf16.vlgmr.msra.gmra.mrb[0].mxu1 %vm855_vm10, %v407_v48  ;;  %v2345_v48 = vld [vmem:[#allocation26 + $0x18] sm:$0xff] (%p786_p0)  }
 0x487   : > { %2132 = vmatprep.mubr.msk.bf16.mxu1 %vm2945_vm9, %v2944_v29  ;;  %2117 = vmatpush3.bf16.msra.mxu1 %v2333_v58  ;;  %v2369_v58 = vld [vmem:[#allocation32 + $0x18] sm:$0xff] (%p786_p0)  }
 0x488   : > { %2118 = vmatprep.subr.bf16.mxu1 %v2944_v29 }
 0x48b   : > { %2119 = vmatpush3.bf16.msra.mxu1 %v2334_v59  ;;  %v2370_v59 = vld [vmem:[#allocation32 + $0x20] sm:$0xff] (%p786_p0)  }
 0x48c   : > { %2120 = vmatprep.subr.bf16.mxu1 %v2944_v29 }
 0x48f   : > { %2121 = vmatpush3.bf16.msra.mxu1 %v2335_v60  ;;  %v2371_v60 = vld [vmem:[#allocation32 + $0x28] sm:$0xff] (%p786_p0)  }
 0x490   : > { %2122 = vmatprep.subr.bf16.mxu1 %v2944_v29 }
 0x493   : > { %2123 = vmatpush3.bf16.msra.mxu1 %v2336_v61  ;;  %v2372_v61 = vld [vmem:[#allocation32 + $0x30] sm:$0xff] (%p786_p0)  }
 0x494   : > { %2124 = vmatprep.subr.bf16.mxu1 %v2944_v29 }
 0x497   : > { %2125 = vmatpush3.bf16.msra.mxu1 %v2337_v62 }
 0x498   : > { %2126 = vmatprep.subr.bf16.mxu1 %v2944_v29 }
 0x49b   : > { %2127 = vmatpush3.bf16.msra.mxu1 %v2338_v63 }
 0x49c   : > { %2128 = vmatprep.subr.bf16.mxu1 %v2944_v29 }
 0x49f   : > { %2129 = vmatpush3.bf16.msra.mxu1 %v2339_v10 }
 0x4a0   : > { %2130 = vmatprep.subr.bf16.mxu1 %v2944_v29  ;;  %v1873_v29 = vld [vmem:[%s1137_s10] ss:$0 sm:$0xff] }
 0x4a3   : > { %2131 = vmatpush3.bf16.msra.mxu1 %v2340_v12 }
 0x4a4   :  { %2142 = vmatprep.subr.bf16.mxu1 (%p786_p0), %v2941_v0 }
 0x559   : > { %v893_v1 = vpop.f32.mrb[0].mxu1 }
 0x55a   : > { %v2094_v2 = vpop.f32.mrb[1].mxu1  ;;  %v900_v5 = vadd.f32 %v2908_v4, %v893_v1 }
 0x55b   : > { %v896_v3 = vpop.f32.mrb[2].mxu1 }
 0x55c   : > { %v901_v6 = vadd.f32 %v2904_v7, %v896_v3  ;;  %v2095_v8 = vpop.f32.mrb[3].mxu1  ;;  %v1876_v3 = vld [vmem:[#allocation28] ss:$0 sm:$0xff] (%p786_p0) }
 0x55e   : > { %v902_v9 = vpack.c.bf16 %v901_v6, %v900_v5 }
 0x560   : > { %2113 = vmatmul.mubr.bf16.vlgmr.msra.gmra.mrb[4].mxu0 %v902_v9 }
 0x561   :  { %2138 = vmatprep.mubr.msk.bf16.mxu0 (%p786_p0), %vm2942_vm0, %v2941_v0 }
 0x633   : > { %v1012_v19 = vpop.f32.mrb[4].mxu0 }
 0x634   : > { %v1013_v20 = vadd.f32 %v1854_v14, %v1012_v19  ;;  %v2114_v22 = vpop.f32.mrb[5].mxu0 }
 0x635   : > { %v1015_v4 = vpop.f32.mrb[6].mxu0  ;;  %v2360_v22 = vld [vmem:[%s3722_s23 + $0x10] sm:$0xff] (%p786_p0)  }
 0x636   : > { %v1016_v24 = vadd.f32 %v1854_v14, %v1015_v4  ;;  %v2115_v7 = vpop.f32.mrb[7].mxu0  ;;  %v1019_v26 = vmax.f32 %v1013_v20, 0.0  ;;  %v2358_v14 = vld [vmem:[%s3722_s23] sm:$0xff] (%p786_p0)   ;;  %v2359_v20 = vld [vmem:[%s3722_s23 + $0x8] sm:$0xff] (%p786_p0)  }
 0x638   : > { %v1020_v28 = vmax.f32 %v1016_v24, 0.0  ;;  %v2362_v24 = vld [vmem:[%s3722_s23 + $0x20] sm:$0xff] (%p786_p0)  }
 0x63a   : > { %v1021_v30 = vpack.c.bf16 %v1020_v28, %v1019_v26  ;;  %v2364_v26 = vld [vmem:[%s3722_s23 + $0x30] sm:$0xff] (%p786_p0)   ;;  %v1208_v28 = vpop.permute.xlu0 (%p786_p0), %1207 }
 0x63c   : > { %2133 = vmatmul.mubr.bf16.vlgmr.msra.gmra.mrb[4].mxu1 %v1021_v30 }
 0x63d   :  { %2158 = vmatprep.mubr.msk.bf16.mxu1 (%p786_p0), %vm2942_vm0, %v2941_v0  ;;  %2143 = vmatpush3.bf16.msra.mxu1 (%p786_p0), %v2342_v51  ;;  %v2379_v51 = vld [vmem:[#allocation34 + $0x28] sm:$0xff] (%p786_p0)  }
 0x63e   :  { %2144 = vmatprep.subr.bf16.mxu1 (%p786_p0), %v2941_v0 }
 0x641   :  { %2145 = vmatpush3.bf16.msra.mxu1 (%p786_p0), %v2343_v53 }
 0x642   :  { %2146 = vmatprep.subr.bf16.mxu1 (%p786_p0), %v2941_v0 }
 0x645   :  { %2147 = vmatpush3.bf16.msra.mxu1 (%p786_p0), %v2344_v44 }
 0x646   :  { %2148 = vmatprep.subr.bf16.mxu1 (%p786_p0), %v2941_v0 }
 0x649   :  { %2149 = vmatpush3.bf16.msra.mxu1 (%p786_p0), %v2345_v48  ;;  %v2380_v48 = vld [vmem:[#allocation34 + $0x30] sm:$0xff] (%p786_p0)  }
 0x64a   :  { %2150 = vmatprep.subr.bf16.mxu1 (%p786_p0), %v2941_v0 }
 0x64d   :  { %2151 = vmatpush3.bf16.msra.mxu1 (%p786_p0), %v2346_v36 }
 0x64e   :  { %2152 = vmatprep.subr.bf16.mxu1 (%p786_p0), %v2941_v0 }
 0x70f   : > { %v1130_v32 = vpop.f32.mrb[4].mxu1 }
 0x710   : > { %v1131_v33 = vadd.f32 %v1864_v31, %v1130_v32  ;;  %v2134_v34 = vpop.f32.mrb[5].mxu1 }
 0x711   : > { %v1133_v37 = vpop.f32.mrb[6].mxu1 }
 0x712   : > { %v1145_v38 = vmul.f32 %v1873_v29, %v1131_v33  ;;  %v1134_v39 = vadd.f32 %v1864_v31, %v1133_v37  ;;  %v2135_v40 = vpop.f32.mrb[7].mxu1  ;;  %v2365_v31 = vld [vmem:[%s3722_s23 + $0x38] sm:$0xff] (%p786_p0)   ;;  %v1885_v33 = vld [vmem:[#allocation31] ss:$0 sm:$0xff] (%p786_p0) }
 0x714   : > { %v1155_v41 = vadd.f32 %v1874_v35, %v1145_v38  ;;  %v1146_v42 = vmul.f32 %v1873_v29, %v1134_v39  ;;  %788 = sbr.rel (!%p786_p0) target bundleno = 924 (0x39c), region = 229  ;;  %v2373_v29 = vld [vmem:[#allocation32 + $0x38] sm:$0xff] (%p786_p0)   ;;  %v2374_v39 = vld [vmem:[#allocation34] sm:$0xff] (%p786_p0)  }
 0x716   : > { %v1157_v43 = vmax.f32 %v1155_v41, 0.0   ;;  %v1156_v49 = vadd.f32 %v1874_v35, %v1146_v42  ;;  %v2375_v42 = vld [vmem:[#allocation34 + $0x8] sm:$0xff] (%p786_p0)  }
 0x718   : > { %v1158_v50 = vmax.f32 %v1156_v49, 0.0   ;;  %v3773_v4 = vmov %v1157_v43  ;;  %v2377_v49 = vld [vmem:[#allocation34 + $0x18] sm:$0xff] (%p786_p0)  }
 0x719   :  { %v2361_v4 = vld [vmem:[%s3722_s23 + $0x18] sm:$0xff] (%p786_p0)  }
 0x71a   : > { %v3772_v7 = vmov %v1158_v50  ;;  %v1159_v52 = vpack.c.bf16 (%p786_p0), %v1158_v50, %v1157_v43  ;;  %v2376_v43 = vld [vmem:[#allocation34 + $0x10] sm:$0xff] (%p786_p0)   ;;  %v2378_v50 = vld [vmem:[#allocation34 + $0x20] sm:$0xff] (%p786_p0)  }
 0x71b   :  { %v2363_v7 = vld [vmem:[%s3722_s23 + $0x28] sm:$0xff]  }
 0x71c   :  { %2137 = vmatpush3.bf16.msra.mxu0 %v1159_v52 }
 0x71d   :  { %2162 = vmatprep.subr.bf16.mxu0 %v2941_v0 }
 0x71f   :  { %2139 = vmatmul.mubr.msk.bf16.vlgmr.msra.gmra.mrb[0].mxu0 %vm793_vm8, %v416_v46  ;;  %v2347_v46 = vld [vmem:[#allocation26 + $0x28] sm:$0xff]  }
 0x720   :  { %2178 = vmatprep.mubr.msk.bf16.mxu0 %vm2942_vm0, %v2941_v0  ;;  %2163 = vmatpush3.bf16.msra.mxu0 %v2350_v47 }
 0x721   :  { %2164 = vmatprep.subr.bf16.mxu0 %v2941_v0  ;;  %2153 = vmatpush3.bf16.msra.mxu1 %v2347_v46 }
 0x722   :  { %2154 = vmatprep.subr.bf16.mxu1 %v2941_v0 }
 0x724   :  { %2165 = vmatpush3.bf16.msra.mxu0 %v2351_v11  ;;  %v2381_v11 = vld [vmem:[#allocation34 + $0x38] sm:$0xff]  }
 0x725   :  { %2166 = vmatprep.subr.bf16.mxu0 %v2941_v0  ;;  %2155 = vmatpush3.bf16.msra.mxu1 %v2348_v15 }
 0x726   :  { %2156 = vmatprep.subr.bf16.mxu1 %v2941_v0 }
 0x728   :  { %2167 = vmatpush3.bf16.msra.mxu0 %v2352_v45  ;;  %v1910_v45 = vld [vmem:[%s3775_s12] ss:$0 sm:$0xff] }
 0x729   :  { %2168 = vmatprep.subr.bf16.mxu0 %v2941_v0  ;;  %2157 = vmatpush3.bf16.msra.mxu1 %v2349_v17 }
 0x72a   :  { %2182 = vmatprep.subr.bf16.mxu1 %v2941_v0 }
 0x72c   :  { %2169 = vmatpush3.bf16.msra.mxu0 %v2353_v13  ;;  %2159 = vmatmul.mubr.bf16.vlgmr.msra.gmra.mrb[0].mxu1 %v1212_v23  ;;  %v1911_v23 = vld [vmem:[%s3776_s26] ss:$0 sm:$0xff] }
 0x72d   :  { %2170 = vmatprep.subr.bf16.mxu0 %v2941_v0  ;;  %2198 = vmatprep.mubr.msk.bf16.mxu1 %vm2942_vm0, %v2941_v0 }
 0x72e   :  { %2183 = vmatpush3.bf16.msra.mxu1 %v2366_v55 }
 0x72f   :  { %2184 = vmatprep.subr.bf16.mxu1 %v2941_v0 }
 0x730   :  { %2171 = vmatpush3.bf16.msra.mxu0 %v2354_v16 }
 0x731   :  { %2172 = vmatprep.subr.bf16.mxu0 %v2941_v0 }
 0x732   :  { %2185 = vmatpush3.bf16.msra.mxu1 %v2367_v56 }
 0x733   :  { %2186 = vmatprep.subr.bf16.mxu1 %v2941_v0 }
 0x734   :  { %2173 = vmatpush3.bf16.msra.mxu0 %v2355_v21 }
 0x735   :  { %2174 = vmatprep.subr.bf16.mxu0 %v2941_v0 }
 0x736   :  { %2187 = vmatpush3.bf16.msra.mxu1 %v2368_v57 }
 0x737   :  { %2188 = vmatprep.subr.bf16.mxu1 %v2941_v0 }
 0x738   :  { %2175 = vmatpush3.bf16.msra.mxu0 %v2356_v25 }
 0x739   :  { %2176 = vmatprep.subr.bf16.mxu0 %v2941_v0 }
 0x73a   :  { %2189 = vmatpush3.bf16.msra.mxu1 %v2369_v58 }
 0x73b   :  { %2190 = vmatprep.subr.bf16.mxu1 %v2941_v0 }
 0x73c   :  { %2177 = vmatpush3.bf16.msra.mxu0 %v2357_v27 }
 0x73d   :  { %2202 = vmatprep.subr.bf16.mxu0 %v2941_v0 }
 0x73e   :  { %2191 = vmatpush3.bf16.msra.mxu1 %v2370_v59 }
 0x73f   :  { %2192 = vmatprep.subr.bf16.mxu1 %v2941_v0 }
 0x742   :  { %2193 = vmatpush3.bf16.msra.mxu1 %v2371_v60 }
 0x743   :  { %2194 = vmatprep.subr.bf16.mxu1 %v2941_v0 }
 0x746   :  { %2195 = vmatpush3.bf16.msra.mxu1 %v2372_v61 }
 0x747   :  { %2196 = vmatprep.subr.bf16.mxu1 %v2941_v0 }
 0x74a   :  { %2197 = vmatpush3.bf16.msra.mxu1 %v2373_v29 }
 0x74b   :  { %2222 = vmatprep.subr.bf16.mxu1 %v2941_v0 }
 0x7f2   :  { %v1198_v62 = vpop.f32.mrb[0].mxu0 }
 0x7f3   :  { %v2140_v63 = vpop.f32.mrb[1].mxu0  ;;  %v1210_v30 = vmul.f32 %v1208_v28, %v1198_v62 }
 0x7f4   :  { %v1201_v1 = vpop.f32.mrb[2].mxu0 }
 0x7f5   :  { %v2141_v2 = vpop.f32.mrb[3].mxu0  ;;  %v1437_v32 = vpack.c.bf16 %v1210_v30, %v1210_v30 }
 0x7ff   :  { %v1318_v5 = vpop.f32.mrb[0].mxu1 }
 0x800   :  { %v1319_v6 = vadd.f32 %v1876_v3, %v1318_v5  ;;  %v2160_v8 = vpop.f32.mrb[1].mxu1 }
 0x801   :  { %v1321_v9 = vpop.f32.mrb[2].mxu1 }
 0x802   :  { %v1324_v10 = vmax.f32 %v1319_v6, 0.0  ;;  %v2161_v12 = vpop.f32.mrb[3].mxu1 }
 0x804   :  { %v1325_v19 = vpack.c.bf16 %v1324_v10, %v1324_v10 }
 0x806   :  { %2179 = vmatmul.mubr.bf16.vlgmr.msra.gmra.mrb[4].mxu0 %v1325_v19 }
 0x807   :  { %2203 = vmatpush3.bf16.msra.mxu0 %v2358_v14  ;;  %2218 = vmatprep.mubr.msk.bf16.mxu0 %vm2942_vm0, %v2941_v0 }
 0x808   :  { %2204 = vmatprep.subr.bf16.mxu0 %v2941_v0 }
 0x80b   :  { %2205 = vmatpush3.bf16.msra.mxu0 %v2359_v20 }
 0x80c   :  { %2206 = vmatprep.subr.bf16.mxu0 %v2941_v0 }
 0x80f   :  { %2207 = vmatpush3.bf16.msra.mxu0 %v2360_v22 }
 0x810   :  { %2208 = vmatprep.subr.bf16.mxu0 %v2941_v0 }
 0x813   :  { %2209 = vmatpush3.bf16.msra.mxu0 %v2361_v4 }
 0x814   :  { %2210 = vmatprep.subr.bf16.mxu0 %v2941_v0 }
 0x817   :  { %2211 = vmatpush3.bf16.msra.mxu0 %v2362_v24 }
 0x818   :  { %2212 = vmatprep.subr.bf16.mxu0 %v2941_v0 }
 0x81b   :  { %2213 = vmatpush3.bf16.msra.mxu0 %v2363_v7 }
 0x81c   :  { %2214 = vmatprep.subr.bf16.mxu0 %v2941_v0 }
 0x81f   :  { %2215 = vmatpush3.bf16.msra.mxu0 %v2364_v26 }
 0x820   :  { %2216 = vmatprep.subr.bf16.mxu0 %v2941_v0 }
 0x823   :  { %2217 = vmatpush3.bf16.msra.mxu0 %v2365_v31 }
 0x826   :  { %2219 = vmatmul.mubr.bf16.vlgmr.msra.gmra.mrb[8].mxu0 %v1437_v32 }
 0x8d9   :  { %v1431_v34 = vpop.f32.mrb[4].mxu0 }
 0x8da   :  { %v1432_v35 = vadd.f32 %v1885_v33, %v1431_v34  ;;  %v2180_v37 = vpop.f32.mrb[5].mxu0 }
 0x8db   :  { %v1434_v38 = vpop.f32.mrb[6].mxu0 }
 0x8dc   :  { %v1454_v40 = vpack.c.bf16 %v1432_v35, %v1432_v35  ;;  %v2181_v41 = vpop.f32.mrb[7].mxu0 }
 0x8de   :  { %2199 = vmatmul.mubr.bf16.vlgmr.msra.gmra.mrb[4].mxu1 %v1454_v40 }
 0x8df   :  { %2223 = vmatpush3.bf16.msra.mxu1 %v2374_v39  ;;  %2238 = vmatprep.mubr.msk.bf16.mxu1 %vm2942_vm0, %v2941_v0 }
 0x8e0   :  { %2224 = vmatprep.subr.bf16.mxu1 %v2941_v0 }
 0x8e3   :  { %2225 = vmatpush3.bf16.msra.mxu1 %v2375_v42 }
 0x8e4   :  { %2226 = vmatprep.subr.bf16.mxu1 %v2941_v0 }
 0x8e7   :  { %2227 = vmatpush3.bf16.msra.mxu1 %v2376_v43 }
 0x8e8   :  { %2228 = vmatprep.subr.bf16.mxu1 %v2941_v0 }
 0x8eb   :  { %2229 = vmatpush3.bf16.msra.mxu1 %v2377_v49 }
 0x8ec   :  { %2230 = vmatprep.subr.bf16.mxu1 %v2941_v0 }
 0x8ef   :  { %2231 = vmatpush3.bf16.msra.mxu1 %v2378_v50 }
 0x8f0   :  { %2232 = vmatprep.subr.bf16.mxu1 %v2941_v0 }
 0x8f3   :  { %2233 = vmatpush3.bf16.msra.mxu1 %v2379_v51 }
 0x8f4   :  { %2234 = vmatprep.subr.bf16.mxu1 %v2941_v0 }
 0x8f7   :  { %2235 = vmatpush3.bf16.msra.mxu1 %v2380_v48 }
 0x8f8   :  { %2236 = vmatprep.subr.bf16.mxu1 %v2941_v0 }
 0x8f9   :  { %v1641_v52 = vpop.f32.mrb[8].mxu0 }
 0x8fa   :  { %v2220_v53 = vpop.f32.mrb[9].mxu0 }
 0x8fb   :  { %v1644_v44 = vpop.f32.mrb[10].mxu0  ;;  %2237 = vmatpush3.bf16.msra.mxu1 %v2381_v11 }
 0x8fc   :  { %v2221_v47 = vpop.f32.mrb[11].mxu0 }
 0x9b1   :  { %v1553_v36 = vpop.f32.mrb[4].mxu1 }
 0x9b2   :  { %v1642_v46 = vadd.f32 %v1641_v52, %v1553_v36  ;;  %v2200_v13 = vpop.f32.mrb[5].mxu1 }
 0x9b3   :  { %v1556_v15 = vpop.f32.mrb[6].mxu1 }
 0x9b4   :  { %v1654_v16 = vadd.f32 %v1910_v45, %v1642_v46  ;;  %v2201_v17 = vpop.f32.mrb[7].mxu1 }
 0x9b6   :  { %v1655_v18 = vmax.f32 %v1654_v16, 0.0 }
 0x9b8   :  { %v1656_v21 = vpack.c.bf16 %v1655_v18, %v1655_v18 }
 0x9ba   :  { %2239 = vmatmul.mubr.bf16.vlgmr.msra.gmra.mrb[8].mxu1 %v1656_v21 }
 0xa8d   :  { %v1762_v0 = vpop.f32.mrb[8].mxu1 }
 0xa8e   :  { %v1763_v25 = vadd.f32 %v1911_v23, %v1762_v0  ;;  %v2240_v27 = vpop.f32.mrb[9].mxu1 }
 0xa8f   :  { %v1765_v54 = vpop.f32.mrb[10].mxu1 }
 0xa90   :  { %1768 = vst [vmem:[#allocation35] sm:$0xff] %v1763_v25  ;;  %v2241_v55 = vpop.f32.mrb[11].mxu1 }
 0xa91   :  { %2855 = shalt.err (!%p2852_p5)
}
 0xa92   :  { %s3777_s7 = sld [smem:[#allocation63_spill]] }
 0xa98   :  { %s2856_s25 = scalar_lea.hbm %s3777_s7, 128 }
 0xa99   :  { %p2857_p6 = scmp.ne.s32.totalorder %s3777_s7, %s2856_s25  ;;  %p2860_p7 = scmp.lt.u32.totalorder %s2856_s25, %s3777_s7 }
 0xa9b   :  { %p2862_p8 = pnand %p2860_p7, %p2857_p6 }
 0xa9d   :  { %2865 = shalt.err (!%p2862_p8)
}
 0xa9e   :  { %1778 = dma.vmem_to_hbm [thread:$0]  %s1776_s0, 128, %s3777_s7, [#allocation4]  }
 0xa9f   :  { %2900 = dma.done.wait [#allocation4], 128  }
 0xaa0   :  { %2901 = vsyncadd [#allocation4], 4294967168 }
 0xaa1   :  { %1782 = vsyncpa [#allocation3], 1 }
 0xaa2   :  { %1783 = vsyncpa [#allocation6], 1 }
 0xaa3   :  { %1784 = vsyncpa [#allocation9], 1 }
 0xaa4   :  { %1785 = vsyncpa [#allocation12], 1 }
 0xaa5   :  { %1786 = vsyncpa [#allocation15], 1 }
 0xaa6   :  { %1787 = vsyncpa [#allocation18], 1 }
 0xaa7   :  { %1788 = vsyncpa [#allocation21], 1 }
 0xaa8   :  { %1789 = vsyncpa [#allocation24], 1 }
 0xaa9   :  { %1790 = vsyncpa [#allocation27], 1 }
 0xaaa   :  { %1791 = vsyncpa [#allocation30], 1 }
 0xaab   :  { %1792 = vsyncpa [#allocation33], 1 }
 0xaac   :  { %1793 = vsyncpa [#allocation4], 1 }

</bundles_post_ra>
